<compile_context>
chip_gen: v7x
topology: tpu7x:2x2x1
jax: 0.10.0
libtpu: 0.0.40
codegen_flags: <defaults>
</compile_context>

<pallas_src>
import jax
import jax.numpy as jnp
from jax.experimental import pallas as pl
from jax.experimental.pallas import tpu as pltpu

EPS = 1e-5


def _round_up(x, m):
    return (x + m - 1) // m * m


def conv_bn_relu_kernel(w_ref, x_ref, gamma_ref, beta_ref, o_ref):
    # w_ref: (TC, Cin)   x_ref: (Cin, M)   gamma/beta: (TC, 1)   o_ref: (TC, M)
    w = w_ref[...]
    x = x_ref[...]

    # 1x1 conv in channel-major orientation: (TC, Cin) @ (Cin, M) on the MXU.
    y = jnp.dot(w, x, preferred_element_type=jnp.float32)            # (TC, M) f32

    # BatchNorm (training mode): biased per-channel batch stats over M = N*H*W.
    # One pass: var = E[y^2] - mean^2.  Both reductions are along the lane axis,
    # so run them as MXU mat-vecs (y @ ones) instead of XLU rotate/add trees.
    m = y.shape[1]
    inv_m = 1.0 / m
    ones = jnp.ones((m, 1), jnp.float32)
    mean = jnp.dot(y, ones, preferred_element_type=jnp.float32) * inv_m        # (TC, 1)
    mean_sq = jnp.dot(y * y, ones, preferred_element_type=jnp.float32) * inv_m # (TC, 1)
    var = jnp.maximum(mean_sq - mean * mean, 0.0)                    # clamp cancellation

    # Fold normalization + affine into one per-channel scale/shift (EUP rsqrt),
    # then a single fused FMA + ReLU on the VPU.
    scale = gamma_ref[...] * jax.lax.rsqrt(var + EPS)                # (TC, 1)
    shift = beta_ref[...] - mean * scale                             # (TC, 1)
    o_ref[...] = jnp.maximum(y * scale + shift, 0.0).astype(o_ref.dtype)


def conv_bn_relu(x_nchw, weight, gamma, beta, *, num_row_blocks=2):
    """x_nchw: (N, C, H, W) f32; weight: (Cout, Cin, 1, 1); gamma/beta: (Cout,)."""
    N, C, H, W = x_nchw.shape
    Cout = weight.shape[0]
    M = N * H * W

    # Native-layout operands: with N == 1 these are pure reshapes (no HBM moves).
    x2d = jnp.transpose(x_nchw, (1, 0, 2, 3)).reshape(C, M)          # (Cin, M)
    w2d = weight.reshape(Cout, C)                                    # (Cout, Cin)
    g2d = gamma.reshape(Cout, 1)
    b2d = beta.reshape(Cout, 1)

    # 2-way Cout split: 248-row blocks (multiple of 8, so the sublane rule holds
    # without padding Cout to 512).  The second block is partial (rows 488..495
    # don't exist); Pallas masks its writeback and per-channel math keeps those
    # rows inert, so no zero-pad (and no extra HBM copy of W) is needed.
    tr = _round_up(pl.cdiv(Cout, num_row_blocks), 8)                 # 248 for Cout=488
    grid = (pl.cdiv(Cout, tr),)                                      # (2,)

    # TODO(synk): largest remaining win is amortizing the fixed launch + 952 KB
    # weight-DMA cost — cross-call prefetch of W (SEMAPHORE+VMEM future) or fusing
    # with the adjacent ShuffleNetV2 depthwise-conv / channel-shuffle / concat ops.
    out2d = pl.pallas_call(
        conv_bn_relu_kernel,
        out_shape=jax.ShapeDtypeStruct((Cout, M), x_nchw.dtype),
        grid=grid,
        in_specs=[
            pl.BlockSpec((tr, C), lambda i: (i, 0)),                 # W row block
            pl.BlockSpec((C, M), lambda i: (0, 0)),                  # X stays resident
            pl.BlockSpec((tr, 1), lambda i: (i, 0)),
            pl.BlockSpec((tr, 1), lambda i: (i, 0)),
        ],
        out_specs=pl.BlockSpec((tr, M), lambda i: (i, 0)),
        compiler_params=pltpu.CompilerParams(
            dimension_semantics=("parallel",),                       # megacore split on v7x
        ),
    )(w2d, x2d, g2d, b2d)

    # (Cout, N*H*W) -> (N, Cout, H, W); free for N == 1.
    return jnp.transpose(out2d.reshape(Cout, N, H, W), (1, 0, 2, 3))


def reference(x_nchw, weight, gamma, beta):
    N, C, H, W = x_nchw.shape
    Cout = weight.shape[0]
    x2d = jnp.transpose(x_nchw, (0, 2, 3, 1)).reshape(-1, C)
    y = x2d @ jnp.transpose(weight.reshape(Cout, C), (1, 0))
    mean = jnp.mean(y, axis=0, keepdims=True)
    var = jnp.mean((y - mean) ** 2, axis=0, keepdims=True)
    y = (y - mean) / jnp.sqrt(var + EPS)
    y = y * gamma.reshape(1, -1) + beta.reshape(1, -1)
    y = jnp.maximum(y, 0.0)
    return jnp.transpose(y.reshape(N, H, W, Cout), (0, 3, 1, 2))


if __name__ == "__main__":
    key = jax.random.PRNGKey(0)
    k_x, k_w, k_g, k_b = jax.random.split(key, 4)

    N, C, H, W = 1, 488, 7, 7  # channel count / spatial size fixed by the module
    x = jax.random.normal(k_x, (N, C, H, W), dtype=jnp.float32)
    # Conv2d(488, 488, 1, bias=False): weight (Cout, Cin, 1, 1)
    weight = jax.random.normal(k_w, (C, C, 1, 1), dtype=jnp.float32) * (1.0 / jnp.sqrt(C))
    # BatchNorm2d affine params
    gamma = 1.0 + 0.1 * jax.random.normal(k_g, (C,), dtype=jnp.float32)
    beta = 0.1 * jax.random.normal(k_b, (C,), dtype=jnp.float32)

    out = conv_bn_relu(x, weight, gamma, beta)
    out = jax.block_until_ready(out)

    ref = reference(x, weight, gamma, beta)
    assert out.shape == (N, C, H, W)
    assert jnp.allclose(out, ref, atol=1e-3, rtol=1e-3)

    print("KERNEL_OK")
</pallas_src>

<mosaic_0001>
module attributes {stable_mosaic.version = 11 : i64} {
  func.func @conv_bn_relu_kernel(%arg0: i32, %arg1: memref<248x488xf32, #tpu.memory_space<vmem>>, %arg2: memref<488x49xf32, #tpu.memory_space<vmem>>, %arg3: memref<248x1xf32, #tpu.memory_space<vmem>>, %arg4: memref<248x1xf32, #tpu.memory_space<vmem>>, %arg5: memref<248x49xf32, #tpu.memory_space<vmem>>) attributes {dimension_semantics = [#tpu.dimension_semantics<parallel>], iteration_bounds = array<i64: 2>, scalar_prefetch = 0 : i64, scratch_operands = 0 : i64, tpu.core_type = #tpu.core_type<tc>, window_params = [{transform_indices = @transform_0, window_bounds = array<i64: 248, 488>}, {pipeline_mode = #tpu.pipeline_mode<synchronous>, transform_indices = @transform_1, window_bounds = array<i64: 488, 49>}, {transform_indices = @transform_2, window_bounds = array<i64: 248, 1>}, {transform_indices = @transform_3, window_bounds = array<i64: 248, 1>}, {transform_indices = @transform_4, window_bounds = array<i64: 248, 49>}]} {
    %c0 = arith.constant 0 : index
    %c0_0 = arith.constant 0 : index
    %0 = vector.load %arg1[%c0, %c0_0] : memref<248x488xf32, #tpu.memory_space<vmem>>, vector<248x488xf32>
    %c0_1 = arith.constant 0 : index
    %c0_2 = arith.constant 0 : index
    %1 = vector.load %arg2[%c0_1, %c0_2] : memref<488x49xf32, #tpu.memory_space<vmem>>, vector<488x49xf32>
    %cst = arith.constant dense<0.000000e+00> : vector<248x49xf32>
    %2 = tpu.matmul %0, %1, %cst {dimension_numbers = #tpu.dot_dimension_numbers<[1], [0], [0], [1], [0, 0, 1, 1], [], []>} : vector<248x488xf32>, vector<488x49xf32>, vector<248x49xf32> -> vector<248x49xf32>
    %cst_3 = arith.constant 1.000000e+00 : f32
    %3 = vector.broadcast %cst_3 : f32 to vector<49x1xf32>
    %cst_4 = arith.constant dense<0.000000e+00> : vector<248x1xf32>
    %4 = tpu.matmul %2, %3, %cst_4 {dimension_numbers = #tpu.dot_dimension_numbers<[1], [0], [0], [1], [0, 0, 1, 1], [], []>} : vector<248x49xf32>, vector<49x1xf32>, vector<248x1xf32> -> vector<248x1xf32>
    %cst_5 = arith.constant 0.0204081628 : f32
    %5 = vector.broadcast %cst_5 : f32 to vector<248x1xf32>
    %6 = arith.mulf %4, %5 : vector<248x1xf32>
    %7 = arith.mulf %2, %2 : vector<248x49xf32>
    %cst_6 = arith.constant dense<0.000000e+00> : vector<248x1xf32>
    %8 = tpu.matmul %7, %3, %cst_6 {dimension_numbers = #tpu.dot_dimension_numbers<[1], [0], [0], [1], [0, 0, 1, 1], [], []>} : vector<248x49xf32>, vector<49x1xf32>, vector<248x1xf32> -> vector<248x1xf32>
    %cst_7 = arith.constant 0.0204081628 : f32
    %9 = vector.broadcast %cst_7 : f32 to vector<248x1xf32>
    %10 = arith.mulf %8, %9 : vector<248x1xf32>
    %11 = arith.mulf %6, %6 : vector<248x1xf32>
    %12 = arith.subf %10, %11 : vector<248x1xf32>
    %cst_8 = arith.constant 0.000000e+00 : f32
    %13 = vector.broadcast %cst_8 : f32 to vector<248x1xf32>
    %14 = arith.maximumf %12, %13 : vector<248x1xf32>
    %c0_9 = arith.constant 0 : index
    %c0_10 = arith.constant 0 : index
    %15 = vector.load %arg3[%c0_9, %c0_10] : memref<248x1xf32, #tpu.memory_space<vmem>>, vector<248x1xf32>
    %cst_11 = arith.constant 9.99999974E-6 : f32
    %16 = vector.broadcast %cst_11 : f32 to vector<248x1xf32>
    %17 = arith.addf %14, %16 : vector<248x1xf32>
    %18 = math.rsqrt %17 : vector<248x1xf32>
    %19 = arith.mulf %15, %18 : vector<248x1xf32>
    %c0_12 = arith.constant 0 : index
    %c0_13 = arith.constant 0 : index
    %20 = vector.load %arg4[%c0_12, %c0_13] : memref<248x1xf32, #tpu.memory_space<vmem>>, vector<248x1xf32>
    %21 = arith.mulf %6, %19 : vector<248x1xf32>
    %22 = arith.subf %20, %21 : vector<248x1xf32>
    %23 = vector.broadcast %19 : vector<248x1xf32> to vector<248x49xf32>
    %24 = arith.mulf %2, %23 : vector<248x49xf32>
    %25 = vector.broadcast %22 : vector<248x1xf32> to vector<248x49xf32>
    %26 = arith.addf %24, %25 : vector<248x49xf32>
    %cst_14 = arith.constant 0.000000e+00 : f32
    %27 = vector.broadcast %cst_14 : f32 to vector<248x49xf32>
    %28 = arith.maximumf %26, %27 : vector<248x49xf32>
    %c0_15 = arith.constant 0 : index
    %c0_16 = arith.constant 0 : index
    %29 = vector.load %arg5[%c0_15, %c0_16] : memref<248x49xf32, #tpu.memory_space<vmem>>, vector<248x49xf32>
    tpu.vector_store %arg5[%c0_15, %c0_16], %28 {strides = array<i32>} : memref<248x49xf32, #tpu.memory_space<vmem>>, vector<248x49xf32>,
    return
  }
  func.func @transform_0(%arg0: i32) -> (i32, i32) {
    %c0_i32 = arith.constant 0 : i32
    %c0_i32_0 = arith.constant 0 : i32
    return %arg0, %c0_i32 : i32, i32
  }
  func.func @transform_1(%arg0: i32) -> (i32, i32) {
    %c0_i32 = arith.constant 0 : i32
    %c0_i32_0 = arith.constant 0 : i32
    %c0_i32_1 = arith.constant 0 : i32
    return %c0_i32, %c0_i32_0 : i32, i32
  }
  func.func @transform_2(%arg0: i32) -> (i32, i32) {
    %c0_i32 = arith.constant 0 : i32
    %c0_i32_0 = arith.constant 0 : i32
    return %arg0, %c0_i32 : i32, i32
  }
  func.func @transform_3(%arg0: i32) -> (i32, i32) {
    %c0_i32 = arith.constant 0 : i32
    %c0_i32_0 = arith.constant 0 : i32
    return %arg0, %c0_i32 : i32, i32
  }
  func.func @transform_4(%arg0: i32) -> (i32, i32) {
    %c0_i32 = arith.constant 0 : i32
    %c0_i32_0 = arith.constant 0 : i32
    return %arg0, %c0_i32 : i32, i32
  }
}

</mosaic_0001>

<bundles_post_ra>
// kernel: tpu_custom_call.1
= control target key start
LH: loop header
LB: loop body
LE: loop exit
PB: predicated region body
PF: predicated region fallthrough
CT: control target
= control target key end

     0   :  { %9 = vsyncpa [#allocation3], 0  ;;  %s5171_s0 = inlined_call_operand.hbm [shape: f32[488,488], index: 0, kind: input, shape index: {}]   ;;  %s5172_s1 = inlined_call_operand.vmem [shape: f32[488,49], index: 1, kind: input, shape index: {}]   ;;  %s5173_s2 = inlined_call_operand.vmem [shape: f32[488,1], index: 2, kind: input, shape index: {}]   ;;  %s5174_s3 = inlined_call_operand.vmem [shape: f32[488,1], index: 3, kind: input, shape index: {}]   ;;  %s5175_s4 = inlined_call_operand.vmem [shape: f32[488,49], index: 4, kind: output, shape index: {}]  }
   0x1   :  { %11 = vsyncpa [#allocation3 + $0x1], 0  ;;  %s3792_s15 = smov 0   ;;  %s3794_s16 = smov 0  }
   0x2   :  { %s3796_s17 = smov 0   ;;  %s3798_s18 = smov 0  }
   0x3 LB: > { %s3811_s19 = sadd.s32 4294967295, %s3724_s18   ;;  %s3814_s20 = sadd.s32 1, %s3724_s18   ;;  %s3724_s18 = sphi %s3798_s18, %s5240_s18   ;;  %s3720_s17 = sphi %s3796_s17, %s5239_s17   ;;  %s3716_s16 = sphi %s3794_s16, %s5238_s16   ;;  %s3712_s15 = sphi %s3792_s15, %s5237_s15  }
   0x4   : > { %s21_s21 = ssub.s32 %s3724_s18, %s3814_s20  ;;  %s24_s22 = sadd.s32 1, %s3720_s17 }
   0x5   : > { %p22_p0 = scmp.eq.s32.totalorder %s21_s21, 0  ;;  %p31_p1 = scmp.ne.s32.totalorder %s3720_s17, %s3716_s16 }
   0x6   : > { %p32_p2 = scmp.eq.s32.totalorder %s3724_s18, 0  ;;  %p37_p3 = scmp.ne.s32.totalorder %s3716_s16, %s3712_s15 }
   0x7   : > { %s3824_s23 = scalar_select %p22_p0, %s3720_s17, %s24_s22  }
   0x8   : > { %p33_p4 = por %p32_p2, %p31_p1  ;;  %p38_p5 = scmp.eq.s32.totalorder %s3811_s19, 0 }
   0x9   : > { %p134_p6 = scmp.eq.s32.totalorder %s3811_s19, 1  ;;  %p2876_p9 = scmp.ge.s32.totalorder %s3724_s18, 2 }
   0xa   : > { %p3828_p7 = por %p38_p5, %p37_p3 }
   0xb   : > { %p3832_p8 = por %p134_p6, %p31_p1  ;;  %159 = sbr.rel (%p2876_p9) target bundleno = 53 (0x35), region = 20 }
  0x12   : > { %162 = sbr.rel (!%p33_p4) target bundleno = 53 (0x35), region = 24  ;;  %s163_s26 = sand.u32 (%p33_p4), 1, %s3720_s17  }
  0x13   : > { %s168_s27 = smul.u32 (%p33_p4), 31, %s3724_s18  ;;  %s3842_s6 = scalar_lea.sflag (%p33_p4), [#allocation3], %s163_s26 }
  0x14   : > { %s3453_s28 = smul.u32 (%p33_p4), 992, %s163_s26 }
  0x15   : > { %s169_s29 = ssub.s32 (%p33_p4), 61, %s168_s27 }
  0x16   : > { %p170_p10 = scmp.lt.s32.totalorder (%p33_p4), %s169_s29, 31  ;;  %s167_s7 = scalar_lea.vmem (%p33_p4), [#allocation2], %s3453_s28 }
  0x19   : > { %s5242_s29 = smov (!%p170_p10, %s169_s29), 31 }
  0x1a   : > { %s3839_s30 = sshll.u32 %s5242_s29, 9 }
  0x1b   : > { %s175_s5 = ssub.s32 15872, %s3839_s30 }
  0x1c   : > { %176 = vsyncadd %s3842_s6, %s175_s5  ;;  %p2879_p11 = scmp.ne.s32.totalorder %s3839_s30, 0  ;;  %s2998_s8 = smul.u32 15872, %s3724_s18 }
  0x1d   : > { %s182_s9 = sshll.u32 %s167_s7, 4  ;;  %s3634_s21 = scalar_lea.hbm %s5171_s0, 31232  ;;  %s3852_s9 = int_to_ptr.vmem [resolvable:$true] %s182_s9 }
  0x1e   : > { %s3850_s12 = scalar_lea.hbm %s5171_s0, %s2998_s8 }
  0x1f   : > { %s3630_s13 = scalar_lea.hbm %s3850_s12, %s3839_s30  ;;  %p3635_p1 = scmp.lt.u32.totalorder %s3850_s12, %s5171_s0 }
  0x20   : > { %p3631_p12 = scmp.ne.s32.totalorder %s3850_s12, %s3630_s13  ;;  %p3636_p2 = scmp.lt.u32.totalorder %s3634_s21, %s3630_s13 }
  0x21   : > { %p3638_p4 = scmp.lt.u32.totalorder %s3630_s13, %s3850_s12 }
  0x22   : > { %p3632_p13 = pnand %p3631_p12, %p2879_p11  ;;  %p3637_p3 = por %p3636_p2, %p3635_p1 }
  0x24   : > { %p3633_p0 = pneg %p3632_p13  ;;  %p3639_p5 = por %p3638_p4, %p3637_p3 }
  0x26   : > { %p3640_p6 = pnand %p3639_p5, %p3633_p0 }
  0x28   : > { %3643 = shalt.err (!%p3640_p6)
}
  0x29   : > { %s3644_s27 = scalar_lea.vmem %s3852_s9, %s3839_s30  ;;  %s3758_s28 = smov [#allocation2]  }
  0x2a   : > { %p3645_p9 = scmp.ne.s32.totalorder %s3852_s9, %s3644_s27  ;;  %s3648_s29 = sshll.u32 %s3758_s28, 4  ;;  %s3649_s29 = int_to_ptr.vmem [resolvable:$false] %s3648_s29 }
  0x2b   : > { %s3650_s5 = scalar_lea.vmem %s3649_s29, 31744  ;;  %p3651_p13 = scmp.lt.s32.totalorder %s3852_s9, %s3649_s29 }
  0x2c   : > { %p3646_p10 = pnand %p3645_p9, %p2879_p11  ;;  %p3652_p1 = scmp.lt.s32.totalorder %s3650_s5, %s3644_s27 }
  0x2e   : > { %p3647_p12 = pneg %p3646_p10  ;;  %p3653_p2 = por %p3652_p1, %p3651_p13 }
  0x30   : > { %p3654_p3 = pnand %p3653_p2, %p3647_p12 }
  0x32   : > { %3657 = shalt.err (!%p3654_p3)
}
  0x33   : > { %s3759_s7 = smov 512   ;;  %s3760_s8 = smov 32  }
  0x34   : > { %188 = dma.hbm_to_vmem [thread:$0]  (%p2879_p11), %s3850_s12, %s3839_s30, %s3852_s9, %s3842_s6, %s3759_s7, %s3759_s7, %s3760_s8  }
  0x35 PF: > { %p2884_p0 = scmp.ge.s32.totalorder %s3724_s18, 1  ;;  %p224_p4 = scmp.lt.s32.totalorder %s3724_s18, 3 }
  0x37   : > { %p225_p5 = pnand %p2884_p0, %p224_p4 }
  0x39   : > { %228 = sbr.rel (%p225_p5) target bundleno = 1153 (0x481), region = 36 }
  0x40   : > { %s3882_s10 = sand.u32 1, %s3716_s16  }
  0x41   : > { %s3454_s11 = smul.u32 992, %s3882_s10  ;;  %s231_s13 = scalar_lea.sflag [#allocation3], %s3882_s10 }
  0x43   : > { %s3886_s14 = scalar_lea.vmem [#allocation2], %s3454_s11 }
  0x44   : > { %3707 = dma.done.wait (%p3828_p7), %s231_s13, 15872  }
  0x45   : > { %3709 = vsyncadd (%p3828_p7), %s231_s13, 4294951424  ;;  %v3761_v0 = vmov 0.0|0.0   ;;  %v439_v1 = vld [vmem:[%s5172_s1] sm:$0xff]  ;;  %v440_v2 = vld [vmem:[%s5172_s1 + $0x8] sm:$0xff]  ;;  %vm500_vm0 = vcmask 850944   ;;  %vm1128_vm1 = vcmask 1040384  }
  0x46   : > { %3289 = vmatprep.subr.bf16.mxu0 %v3761_v0  ;;  %3379 = vmatprep.subr.bf16.mxu1 %v3761_v0  ;;  %v441_v3 = vld [vmem:[%s5172_s1 + $0x10] sm:$0xff]  ;;  %v3290_v4 = vpack.c.bf16 %v440_v2, %v439_v1  ;;  %v442_v5 = vld [vmem:[%s5172_s1 + $0x18] sm:$0xff]  ;;  %v443_v7 = vld [vmem:[%s5172_s1 + $0x20] sm:$0xff]  ;;  %vm3765_vm2 = vmmov 0   ;;  %vm1034_vm3 = vcmask 400384   ;;  %s3455_s12 = smul.u32 248, %s3882_s10 }
  0x47   : > { %v3293_v6 = vpack.c.bf16 %v442_v5, %v441_v3  ;;  %v444_v8 = vld [vmem:[%s5172_s1 + $0x28] sm:$0xff]  ;;  %v445_v10 = vld [vmem:[%s5172_s1 + $0x30] sm:$0xff]  ;;  %v446_v11 = vld [vmem:[%s5172_s1 + $0x38] sm:$0xff]  ;;  %s2997_s24 = smul.u32 (%p3832_p8), 248, %s3811_s19 }
  0x48   : > { %3291 = vmatpush1.bf16.msra.mxu0 %v3290_v4  ;;  %v3296_v9 = vpack.c.bf16 %v444_v8, %v443_v7  ;;  %v316_v12 = vld [vmem:[%s3886_s14 + $0x8] sm:$0xff]  ;;  %v3299_v13 = vpack.c.bf16 %v446_v11, %v445_v10  ;;  %v447_v14 = vld [vmem:[%s5172_s1 + $0x40] sm:$0xff]  ;;  %v449_v17 = vld [vmem:[%s5172_s1 + $0x50] sm:$0xff]  ;;  %s4946_s15 = scalar_lea.vmem [#allocation4], %s3455_s12  }
  0x49   : > { %3292 = vmatprep.subr.bf16.mxu0 %v3761_v0  ;;  %658 = vmatprep.mubr.f32.mxu0 %v316_v12  ;;  %v448_v15 = vld [vmem:[%s5172_s1 + $0x48] sm:$0xff]  ;;  %v450_v18 = vld [vmem:[%s5172_s1 + $0x58] sm:$0xff]  ;;  %v451_v20 = vld [vmem:[%s5172_s1 + $0x60] sm:$0xff]  ;;  %s5046_s26 = scalar_lea.vmem (%p3832_p8), %s5175_s4, %s2997_s24  }
  0x4a   : > { %v3302_v16 = vpack.c.bf16 %v448_v15, %v447_v14  ;;  %v3305_v19 = vpack.c.bf16 %v450_v18, %v449_v17  ;;  %v452_v21 = vld [vmem:[%s5172_s1 + $0x68] sm:$0xff]  ;;  %v453_v23 = vld [vmem:[%s5172_s1 + $0x70] sm:$0xff]  ;;  %v454_v24 = vld [vmem:[%s5172_s1 + $0x78] sm:$0xff] }
  0x4b   : > { %v3308_v22 = vpack.c.bf16 %v452_v21, %v451_v20  ;;  %v3311_v25 = vpack.c.bf16 %v454_v24, %v453_v23  ;;  %v455_v26 = vld [vmem:[%s5172_s1 + $0x80] sm:$0xff]  ;;  %v456_v27 = vld [vmem:[%s5172_s1 + $0x88] sm:$0xff]  ;;  %v457_v29 = vld [vmem:[%s5172_s1 + $0x90] sm:$0xff] }
  0x4c   : > { %3294 = vmatpush1.bf16.msra.mxu0 %v3293_v6  ;;  %v3314_v28 = vpack.c.bf16 %v456_v27, %v455_v26  ;;  %v458_v30 = vld [vmem:[%s5172_s1 + $0x98] sm:$0xff]  ;;  %v459_v32 = vld [vmem:[%s5172_s1 + $0xa0] sm:$0xff]  ;;  %v460_v33 = vld [vmem:[%s5172_s1 + $0xa8] sm:$0xff] }
  0x4d   : > { %3295 = vmatprep.subr.bf16.mxu0 %v3761_v0  ;;  %v3317_v31 = vpack.c.bf16 %v458_v30, %v457_v29  ;;  %v3320_v34 = vpack.c.bf16 %v460_v33, %v459_v32  ;;  %v461_v35 = vld [vmem:[%s5172_s1 + $0xb0] sm:$0xff]  ;;  %v462_v36 = vld [vmem:[%s5172_s1 + $0xb8] sm:$0xff]  ;;  %v463_v38 = vld [vmem:[%s5172_s1 + $0xc0] sm:$0xff] }
  0x4e   : > { %v3323_v37 = vpack.c.bf16 %v462_v36, %v461_v35  ;;  %v464_v39 = vld [vmem:[%s5172_s1 + $0xc8] sm:$0xff]  ;;  %v465_v41 = vld [vmem:[%s5172_s1 + $0xd0] sm:$0xff]  ;;  %v466_v42 = vld [vmem:[%s5172_s1 + $0xd8] sm:$0xff] }
  0x4f   : > { %v3326_v40 = vpack.c.bf16 %v464_v39, %v463_v38  ;;  %v3329_v43 = vpack.c.bf16 %v466_v42, %v465_v41  ;;  %v467_v44 = vld [vmem:[%s5172_s1 + $0xe0] sm:$0xff]  ;;  %v468_v45 = vld [vmem:[%s5172_s1 + $0xe8] sm:$0xff]  ;;  %v469_v47 = vld [vmem:[%s5172_s1 + $0xf0] sm:$0xff] }
  0x50   : > { %3297 = vmatpush1.bf16.msra.mxu0 %v3296_v9  ;;  %v3332_v46 = vpack.c.bf16 %v468_v45, %v467_v44  ;;  %v470_v48 = vld [vmem:[%s5172_s1 + $0xf8] sm:$0xff]  ;;  %v471_v50 = vld [vmem:[%s5172_s1 + $0x100] sm:$0xff]  ;;  %v472_v51 = vld [vmem:[%s5172_s1 + $0x108] sm:$0xff] }
  0x51   : > { %3298 = vmatprep.subr.bf16.mxu0 %v3761_v0  ;;  %v3335_v49 = vpack.c.bf16 %v470_v48, %v469_v47  ;;  %v315_v52 = vld [vmem:[%s3886_s14] sm:$0xff]  ;;  %v3338_v53 = vpack.c.bf16 %v472_v51, %v471_v50  ;;  %v320_v54 = vld [vmem:[%s3886_s14 + $0x28] sm:$0xff]  ;;  %v473_v55 = vld [vmem:[%s5172_s1 + $0x110] sm:$0xff] }
  0x52   : > { %v474_v56 = vld [vmem:[%s5172_s1 + $0x118] sm:$0xff]  ;;  %v319_v57 = vld [vmem:[%s3886_s14 + $0x20] sm:$0xff]  ;;  %v324_v59 = vld [vmem:[%s3886_s14 + $0x48] sm:$0xff] }
  0x53   : > { %v3341_v58 = vpack.c.bf16 %v474_v56, %v473_v55  ;;  %v475_v60 = vld [vmem:[%s5172_s1 + $0x120] sm:$0xff]  ;;  %v476_v61 = vld [vmem:[%s5172_s1 + $0x128] sm:$0xff]  ;;  %v477_v2 = vld [vmem:[%s5172_s1 + $0x130] sm:$0xff] }
  0x54   : > { %3300 = vmatpush1.bf16.msra.mxu0 %v3299_v13  ;;  %v323_v62 = vld [vmem:[%s3886_s14 + $0x40] sm:$0xff]  ;;  %v3344_v63 = vpack.c.bf16 %v476_v61, %v475_v60  ;;  %v328_v1 = vld [vmem:[%s3886_s14 + $0x68] sm:$0xff]  ;;  %v478_v3 = vld [vmem:[%s5172_s1 + $0x138] sm:$0xff] }
  0x55   : > { %3301 = vmatprep.subr.bf16.mxu0 %v3761_v0  ;;  %v327_v4 = vld [vmem:[%s3886_s14 + $0x60] sm:$0xff]  ;;  %v3347_v5 = vpack.c.bf16 %v478_v3, %v477_v2  ;;  %v332_v6 = vld [vmem:[%s3886_s14 + $0x88] sm:$0xff]  ;;  %v481_v12 = vld [vmem:[%s5172_s1 + $0x150] sm:$0xff] }
  0x56   : > { %v479_v7 = vld [vmem:[%s5172_s1 + $0x140] sm:$0xff]  ;;  %v480_v8 = vld [vmem:[%s5172_s1 + $0x148] sm:$0xff]  ;;  %v482_v13 = vld [vmem:[%s5172_s1 + $0x158] sm:$0xff] }
  0x57   : > { %v331_v9 = vld [vmem:[%s3886_s14 + $0x80] sm:$0xff]  ;;  %v3350_v10 = vpack.c.bf16 %v480_v8, %v479_v7  ;;  %v336_v11 = vld [vmem:[%s3886_s14 + $0xa8] sm:$0xff]  ;;  %v3353_v15 = vpack.c.bf16 %v482_v13, %v481_v12  ;;  %v486_v23 = vld [vmem:[%s5172_s1 + $0x178] sm:$0xff] }
  0x58   : > { %3303 = vmatpush1.bf16.msra.mxu0 %v3302_v16  ;;  %v335_v14 = vld [vmem:[%s3886_s14 + $0xa0] sm:$0xff]  ;;  %v340_v16 = vld [vmem:[%s3886_s14 + $0xc8] sm:$0xff]  ;;  %v489_v32 = vld [vmem:[%s5172_s1 + $0x190] sm:$0xff] }
  0x59   : > { %3304 = vmatprep.subr.bf16.mxu0 %v3761_v0  ;;  %v483_v17 = vld [vmem:[%s5172_s1 + $0x160] sm:$0xff]  ;;  %v484_v18 = vld [vmem:[%s5172_s1 + $0x168] sm:$0xff]  ;;  %v490_v33 = vld [vmem:[%s5172_s1 + $0x198] sm:$0xff] }
  0x5a   : > { %v3356_v20 = vpack.c.bf16 %v484_v18, %v483_v17  ;;  %v344_v21 = vld [vmem:[%s3886_s14 + $0xe8] sm:$0xff]  ;;  %v343_v24 = vld [vmem:[%s3886_s14 + $0xe0] sm:$0xff]  ;;  %v3365_v35 = vpack.c.bf16 %v490_v33, %v489_v32  ;;  %v493_v42 = vld [vmem:[%s5172_s1 + $0x1b0] sm:$0xff] }
  0x5b   : > { %v348_v26 = vld [vmem:[%s3886_s14 + $0x108] sm:$0xff]  ;;  %v487_v27 = vld [vmem:[%s5172_s1 + $0x180] sm:$0xff]  ;;  %v322_v32 = vld [vmem:[%s3886_s14 + $0x38] sm:$0xff] }
  0x5c   : > { %3306 = vmatpush1.bf16.msra.mxu0 %v3305_v19  ;;  %v339_v19 = vld [vmem:[%s3886_s14 + $0xc0] sm:$0xff]  ;;  %v356_v36 = vld [vmem:[%s3886_s14 + $0x148] sm:$0xff]  ;;  %v321_v33 = vld [vmem:[%s3886_s14 + $0x30] sm:$0xff] }
  0x5d   : > { %3307 = vmatprep.subr.bf16.mxu0 %v3761_v0  ;;  %v347_v29 = vld [vmem:[%s3886_s14 + $0x100] sm:$0xff]  ;;  %v492_v38 = vld [vmem:[%s5172_s1 + $0x1a8] sm:$0xff] }
  0x5e   : > { %v355_v39 = vld [vmem:[%s3886_s14 + $0x140] sm:$0xff]  ;;  %v360_v41 = vld [vmem:[%s3886_s14 + $0x168] sm:$0xff] }
  0x5f   : > { %v359_v44 = vld [vmem:[%s3886_s14 + $0x160] sm:$0xff]  ;;  %v496_v48 = vld [vmem:[%s5172_s1 + $0x1c8] sm:$0xff] }
  0x60   : > { %3309 = vmatpush1.bf16.msra.mxu0 %v3308_v22  ;;  %v485_v22 = vld [vmem:[%s5172_s1 + $0x170] sm:$0xff]  ;;  %v495_v47 = vld [vmem:[%s5172_s1 + $0x1c0] sm:$0xff]  ;;  %v368_v51 = vld [vmem:[%s3886_s14 + $0x1a8] sm:$0xff] }
  0x61   : > { %3310 = vmatprep.subr.bf16.mxu0 %v3761_v0  ;;  %v3374_v50 = vpack.c.bf16 %v496_v48, %v495_v47  ;;  %v372_v56 = vld [vmem:[%s3886_s14 + $0x1c8] sm:$0xff]  ;;  %v499_v60 = vld [vmem:[%s5172_s1 + $0x1e0] sm:$0xff]  ;;  %v349_v47 = vld [vmem:[%s3886_s14 + $0x110] sm:$0xff] }
  0x62   : > { %v375_v61 = vld [vmem:[%s3886_s14 + $0x1e0] sm:$0xff]  ;;  %v388_v3 = vld [vmem:[%s3886_s14 + $0x248] sm:$0xff]  ;;  %v354_v48 = vld [vmem:[%s3886_s14 + $0x138] sm:$0xff] }
  0x63   : > { %v383_v2 = vld [vmem:[%s3886_s14 + $0x220] sm:$0xff]  ;;  %v396_v7 = vld [vmem:[%s3886_s14 + $0x288] sm:$0xff] }
  0x64   : > { %3312 = vmatpush1.bf16.msra.mxu0 %v3311_v25  ;;  %v3359_v25 = vpack.c.bf16 %v486_v23, %v485_v22  ;;  %v395_v8 = vld [vmem:[%s3886_s14 + $0x280] sm:$0xff]  ;;  %v408_v13 = vld [vmem:[%s3886_s14 + $0x2e8] sm:$0xff] }
  0x65   : > { %3313 = vmatprep.subr.bf16.mxu0 %v3761_v0  ;;  %v403_v12 = vld [vmem:[%s3886_s14 + $0x2c0] sm:$0xff]  ;;  %v416_v17 = vld [vmem:[%s3886_s14 + $0x328] sm:$0xff] }
  0x66   : > { %v415_v18 = vld [vmem:[%s3886_s14 + $0x320] sm:$0xff]  ;;  %v428_v23 = vld [vmem:[%s3886_s14 + $0x388] sm:$0xff] }
  0x67   : > { %v423_v22 = vld [vmem:[%s3886_s14 + $0x360] sm:$0xff] }
  0x68   : > { %3315 = vmatpush1.bf16.msra.mxu0 %v3314_v28  ;;  %v488_v28 = vld [vmem:[%s5172_s1 + $0x188] sm:$0xff] }
  0x69   : > { %3316 = vmatprep.subr.bf16.mxu0 %v3761_v0  ;;  %v3362_v30 = vpack.c.bf16 %v488_v28, %v487_v27  ;;  %v436_v27 = vld [vmem:[%s3886_s14 + $0x3c8] sm:$0xff]  ;;  %v435_v28 = vld [vmem:[%s3886_s14 + $0x3c0] sm:$0xff] }
  0x6c   : > { %3318 = vmatpush1.bf16.msra.mxu0 %v3317_v31  ;;  %v352_v31 = vld [vmem:[%s3886_s14 + $0x128] sm:$0xff] }
  0x6d   : > { %3319 = vmatprep.subr.bf16.mxu0 %v3761_v0 }
  0x70   : > { %3321 = vmatpush1.bf16.msra.mxu0 %v3320_v34  ;;  %v351_v34 = vld [vmem:[%s3886_s14 + $0x120] sm:$0xff] }
  0x71   : > { %3322 = vmatprep.subr.bf16.mxu0 %v3761_v0 }
  0x74   : > { %3324 = vmatpush1.bf16.msra.mxu0 %v3323_v37  ;;  %v491_v37 = vld [vmem:[%s5172_s1 + $0x1a0] sm:$0xff] }
  0x75   : > { %3325 = vmatprep.subr.bf16.mxu0 %v3761_v0 }
  0x78   : > { %3327 = vmatpush1.bf16.msra.mxu0 %v3326_v40  ;;  %v3368_v40 = vpack.c.bf16 %v492_v38, %v491_v37  ;;  %v329_v37 = vld [vmem:[%s3886_s14 + $0x70] sm:$0xff]  ;;  %v334_v38 = vld [vmem:[%s3886_s14 + $0x98] sm:$0xff] }
  0x79   : > { %3328 = vmatprep.subr.bf16.mxu0 %v3761_v0 }
  0x7c   : > { %3330 = vmatpush1.bf16.msra.mxu0 %v3329_v43  ;;  %v494_v43 = vld [vmem:[%s5172_s1 + $0x1b8] sm:$0xff] }
  0x7d   : > { %3331 = vmatprep.subr.bf16.mxu0 %v3761_v0  ;;  %v3371_v45 = vpack.c.bf16 %v494_v43, %v493_v42  ;;  %v342_v42 = vld [vmem:[%s3886_s14 + $0xd8] sm:$0xff]  ;;  %v341_v43 = vld [vmem:[%s3886_s14 + $0xd0] sm:$0xff] }
  0x80   : > { %3333 = vmatpush1.bf16.msra.mxu0 %v3332_v46  ;;  %v364_v46 = vld [vmem:[%s3886_s14 + $0x188] sm:$0xff] }
  0x81   : > { %3334 = vmatprep.subr.bf16.mxu0 %v3761_v0 }
  0x84   : > { %3336 = vmatpush1.bf16.msra.mxu0 %v3335_v49  ;;  %v363_v49 = vld [vmem:[%s3886_s14 + $0x180] sm:$0xff] }
  0x85   : > { %3337 = vmatprep.subr.bf16.mxu0 %v3761_v0 }
  0x87   : > { %659 = vmatmul.mubr.f32.vlgmr.msra.gmra.mrb[0].mxu0 %v315_v52  ;;  %v497_v52 = vld [vmem:[%s5172_s1 + $0x1d0] sm:$0xff] }
  0x88   : > { %3339 = vmatpush1.bf16.msra.mxu0 %v3338_v53  ;;  %663 = vmatprep.mubr.f32.mxu0 %v320_v54  ;;  %v498_v53 = vld [vmem:[%s5172_s1 + $0x1d8] sm:$0xff]  ;;  %v367_v54 = vld [vmem:[%s3886_s14 + $0x1a0] sm:$0xff] }
  0x89   : > { %3340 = vmatprep.subr.bf16.mxu0 %v3761_v0  ;;  %v3377_v55 = vpack.c.bf16 %v498_v53, %v497_v52  ;;  %v362_v52 = vld [vmem:[%s3886_s14 + $0x178] sm:$0xff]  ;;  %v361_v53 = vld [vmem:[%s3886_s14 + $0x170] sm:$0xff] }
  0x8b   : > { %664 = vmatmul.mubr.f32.gmra.mrb[2].mxu0 %v319_v57  ;;  %v371_v57 = vld [vmem:[%s3886_s14 + $0x1c0] sm:$0xff] }
  0x8c   : > { %668 = vmatprep.mubr.f32.mxu0 %v324_v59  ;;  %3342 = vmatpush1.bf16.msra.mxu0 %v3341_v58  ;;  %v376_v58 = vld [vmem:[%s3886_s14 + $0x1e8] sm:$0xff]  ;;  %v3762_v59 = vmov 0.0  }
  0x8d   : > { %3343 = vmatprep.subr.bf16.mxu0 %v3761_v0  ;;  %3089 = vmatprep.mubr.msk.f32.mxu1 %vm3765_vm2, %v3762_v59 }
  0x8f   : > { %669 = vmatmul.mubr.f32.gmra.mrb[4].mxu0 %v323_v62  ;;  %v380_v62 = vld [vmem:[%s3886_s14 + $0x208] sm:$0xff] }
  0x90   : > { %673 = vmatprep.mubr.f32.mxu0 %v328_v1  ;;  %3345 = vmatpush1.bf16.msra.mxu0 %v3344_v63  ;;  %v379_v63 = vld [vmem:[%s3886_s14 + $0x200] sm:$0xff]  ;;  %v384_v1 = vld [vmem:[%s3886_s14 + $0x228] sm:$0xff] }
  0x91   : > { %3346 = vmatprep.subr.bf16.mxu0 %v3761_v0 }
  0x93   : > { %674 = vmatmul.mubr.f32.gmra.mrb[6].mxu0 %v327_v4  ;;  %v387_v4 = vld [vmem:[%s3886_s14 + $0x240] sm:$0xff] }
  0x94   : > { %678 = vmatprep.mubr.f32.mxu0 %v332_v6  ;;  %3348 = vmatpush1.bf16.msra.mxu0 %v3347_v5  ;;  %v392_v5 = vld [vmem:[%s3886_s14 + $0x268] sm:$0xff]  ;;  %v391_v6 = vld [vmem:[%s3886_s14 + $0x260] sm:$0xff] }
  0x95   : > { %3349 = vmatprep.subr.bf16.mxu0 %v3761_v0 }
  0x97   : > { %679 = vmatmul.mubr.f32.gmra.mrb[8].mxu0 %v331_v9  ;;  %v400_v9 = vld [vmem:[%s3886_s14 + $0x2a8] sm:$0xff] }
  0x98   : > { %683 = vmatprep.mubr.f32.mxu0 %v336_v11  ;;  %3351 = vmatpush1.bf16.msra.mxu0 %v3350_v10  ;;  %v399_v10 = vld [vmem:[%s3886_s14 + $0x2a0] sm:$0xff]  ;;  %v404_v11 = vld [vmem:[%s3886_s14 + $0x2c8] sm:$0xff] }
  0x99   : > { %3352 = vmatprep.subr.bf16.mxu0 %v3761_v0 }
  0x9b   : > { %684 = vmatmul.mubr.f32.gmra.mrb[10].mxu0 %v335_v14  ;;  %v407_v14 = vld [vmem:[%s3886_s14 + $0x2e0] sm:$0xff] }
  0x9c   : > { %688 = vmatprep.mubr.f32.mxu0 %v340_v16  ;;  %3354 = vmatpush1.bf16.msra.mxu0 %v3353_v15  ;;  %v412_v15 = vld [vmem:[%s3886_s14 + $0x308] sm:$0xff]  ;;  %v411_v16 = vld [vmem:[%s3886_s14 + $0x300] sm:$0xff] }
  0x9d   : > { %3355 = vmatprep.subr.bf16.mxu0 %v3761_v0 }
  0x9f   : > { %689 = vmatmul.mubr.f32.gmra.mrb[12].mxu0 %v339_v19  ;;  %v420_v19 = vld [vmem:[%s3886_s14 + $0x348] sm:$0xff] }
  0xa0   : > { %693 = vmatprep.mubr.f32.mxu0 %v344_v21  ;;  %3357 = vmatpush1.bf16.msra.mxu0 %v3356_v20  ;;  %v419_v20 = vld [vmem:[%s3886_s14 + $0x340] sm:$0xff]  ;;  %v424_v21 = vld [vmem:[%s3886_s14 + $0x368] sm:$0xff] }
  0xa1   : > { %3358 = vmatprep.subr.bf16.mxu0 %v3761_v0 }
  0xa3   : > { %694 = vmatmul.mubr.f32.gmra.mrb[14].mxu0 %v343_v24  ;;  %v427_v24 = vld [vmem:[%s3886_s14 + $0x380] sm:$0xff] }
  0xa4   : > { %698 = vmatprep.mubr.f32.mxu0 %v348_v26  ;;  %3360 = vmatpush1.bf16.msra.mxu0 %v3359_v25  ;;  %v432_v25 = vld [vmem:[%s3886_s14 + $0x3a8] sm:$0xff]  ;;  %v431_v26 = vld [vmem:[%s3886_s14 + $0x3a0] sm:$0xff] }
  0xa5   : > { %3361 = vmatprep.subr.bf16.mxu0 %v3761_v0 }
  0xa7   : > { %699 = vmatmul.mubr.f32.gmra.mrb[16].mxu0 %v347_v29  ;;  %v3763_v29 = vmov 1.0|1.0  }
  0xa8   : > { %703 = vmatprep.mubr.f32.mxu0 %v352_v31  ;;  %3363 = vmatpush1.bf16.msra.mxu0 %v3362_v30  ;;  %v318_v30 = vld [vmem:[%s3886_s14 + $0x18] sm:$0xff]  ;;  %v317_v31 = vld [vmem:[%s3886_s14 + $0x10] sm:$0xff] }
  0xa9   : > { %3364 = vmatprep.subr.bf16.mxu0 %v3761_v0  ;;  %3380 = vmatpush3.bf16.msra.mxu1 %v3763_v29 }
  0xaa   : > { %3381 = vmatprep.subr.bf16.mxu1 %v3761_v0 }
  0xab   : > { %704 = vmatmul.mubr.f32.gmra.mrb[18].mxu0 %v351_v34  ;;  %v326_v34 = vld [vmem:[%s3886_s14 + $0x58] sm:$0xff] }
  0xac   : > { %708 = vmatprep.mubr.f32.mxu0 %v356_v36  ;;  %3366 = vmatpush1.bf16.msra.mxu0 %v3365_v35  ;;  %v325_v35 = vld [vmem:[%s3886_s14 + $0x50] sm:$0xff]  ;;  %v330_v36 = vld [vmem:[%s3886_s14 + $0x78] sm:$0xff] }
  0xad   : > { %3367 = vmatprep.subr.bf16.mxu0 %v3761_v0  ;;  %3382 = vmatpush3.bf16.msra.mxu1 %v3763_v29 }
  0xae   : > { %3383 = vmatprep.subr.bf16.mxu1 %v3761_v0 }
  0xaf   : > { %709 = vmatmul.mubr.f32.gmra.mrb[20].mxu0 %v355_v39  ;;  %v333_v39 = vld [vmem:[%s3886_s14 + $0x90] sm:$0xff] }
  0xb0   : > { %713 = vmatprep.mubr.f32.mxu0 %v360_v41  ;;  %3369 = vmatpush1.bf16.msra.mxu0 %v3368_v40  ;;  %v338_v40 = vld [vmem:[%s3886_s14 + $0xb8] sm:$0xff]  ;;  %v337_v41 = vld [vmem:[%s3886_s14 + $0xb0] sm:$0xff] }
  0xb1   : > { %3370 = vmatprep.subr.bf16.mxu0 %v3761_v0  ;;  %3384 = vmatpush3.bf16.msra.mxu1 %v3763_v29 }
  0xb2   : > { %3087 = vmatprep.subr.mxu1 %v3762_v59 }
  0xb3   : > { %714 = vmatmul.mubr.f32.gmra.mrb[22].mxu0 %v359_v44  ;;  %v346_v44 = vld [vmem:[%s3886_s14 + $0xf8] sm:$0xff] }
  0xb4   : > { %718 = vmatprep.mubr.f32.mxu0 %v364_v46  ;;  %3372 = vmatpush1.bf16.msra.mxu0 %v3371_v45  ;;  %v345_v45 = vld [vmem:[%s3886_s14 + $0xf0] sm:$0xff]  ;;  %v350_v46 = vld [vmem:[%s3886_s14 + $0x118] sm:$0xff] }
  0xb5   : > { %3373 = vmatprep.subr.bf16.mxu0 %v3761_v0 }
  0xb7   : > { %719 = vmatmul.mubr.f32.gmra.mrb[24].mxu0 %v363_v49  ;;  %v353_v49 = vld [vmem:[%s3886_s14 + $0x130] sm:$0xff] }
  0xb8   : > { %723 = vmatprep.mubr.f32.mxu0 %v368_v51  ;;  %3375 = vmatpush1.bf16.msra.mxu0 %v3374_v50  ;;  %v358_v50 = vld [vmem:[%s3886_s14 + $0x158] sm:$0xff]  ;;  %v357_v51 = vld [vmem:[%s3886_s14 + $0x150] sm:$0xff] }
  0xb9   : > { %3376 = vmatprep.subr.bf16.mxu0 %v3761_v0 }
  0xbb   : > { %724 = vmatmul.mubr.f32.gmra.mrb[26].mxu0 %v367_v54  ;;  %v366_v54 = vld [vmem:[%s3886_s14 + $0x198] sm:$0xff] }
  0xbc   : > { %728 = vmatprep.mubr.f32.mxu0 %v372_v56  ;;  %3378 = vmatpush1.bf16.msra.mxu0 %v3377_v55  ;;  %v365_v55 = vld [vmem:[%s3886_s14 + $0x190] sm:$0xff]  ;;  %v370_v56 = vld [vmem:[%s3886_s14 + $0x1b8] sm:$0xff] }
  0xbd   : > { %870 = vmatprep.subr.mxu0 %v3762_v59 }
  0xbf   : > { %729 = vmatmul.mubr.f32.gmra.mrb[28].mxu0 %v371_v57  ;;  %v369_v57 = vld [vmem:[%s3886_s14 + $0x1b0] sm:$0xff] }
  0xc0   : > { %733 = vmatprep.mubr.f32.mxu0 %v376_v58  ;;  %871 = vmatpush1.msra.mxu0 %v499_v60  ;;  %v374_v58 = vld [vmem:[%s3886_s14 + $0x1d8] sm:$0xff]  ;;  %v373_v60 = vld [vmem:[%s3886_s14 + $0x1d0] sm:$0xff] }
  0xc3   : > { %734 = vmatmul.mubr.f32.gmra.mrb[30].mxu0 %v375_v61  ;;  %v378_v61 = vld [vmem:[%s3886_s14 + $0x1f8] sm:$0xff] }
  0xc4   : > { %738 = vmatprep.mubr.f32.mxu0 %v380_v62  ;;  %v377_v62 = vld [vmem:[%s3886_s14 + $0x1f0] sm:$0xff] }
  0xc7   : > { %739 = vmatmul.mubr.f32.gmra.mrb[32].mxu0 %v379_v63  ;;  %v382_v63 = vld [vmem:[%s3886_s14 + $0x218] sm:$0xff] }
  0xc8   : > { %743 = vmatprep.mubr.f32.mxu0 %v384_v1  ;;  %v381_v1 = vld [vmem:[%s3886_s14 + $0x210] sm:$0xff] }
  0xcb   : > { %744 = vmatmul.mubr.f32.gmra.mrb[34].mxu0 %v383_v2  ;;  %v386_v2 = vld [vmem:[%s3886_s14 + $0x238] sm:$0xff] }
  0xcc   : > { %748 = vmatprep.mubr.f32.mxu0 %v388_v3  ;;  %v385_v3 = vld [vmem:[%s3886_s14 + $0x230] sm:$0xff] }
  0xcf   : > { %749 = vmatmul.mubr.f32.gmra.mrb[36].mxu0 %v387_v4  ;;  %v390_v4 = vld [vmem:[%s3886_s14 + $0x258] sm:$0xff] }
  0xd0   : > { %753 = vmatprep.mubr.f32.mxu0 %v392_v5  ;;  %v389_v5 = vld [vmem:[%s3886_s14 + $0x250] sm:$0xff] }
  0xd3   : > { %754 = vmatmul.mubr.f32.gmra.mrb[38].mxu0 %v391_v6  ;;  %v394_v6 = vld [vmem:[%s3886_s14 + $0x278] sm:$0xff] }
  0xd4   : > { %758 = vmatprep.mubr.f32.mxu0 %v396_v7  ;;  %v393_v7 = vld [vmem:[%s3886_s14 + $0x270] sm:$0xff] }
  0xd7   : > { %759 = vmatmul.mubr.f32.gmra.mrb[40].mxu0 %v395_v8  ;;  %v398_v8 = vld [vmem:[%s3886_s14 + $0x298] sm:$0xff] }
  0xd8   : > { %763 = vmatprep.mubr.f32.mxu0 %v400_v9  ;;  %v397_v9 = vld [vmem:[%s3886_s14 + $0x290] sm:$0xff] }
  0xdb   : > { %764 = vmatmul.mubr.f32.gmra.mrb[42].mxu0 %v399_v10  ;;  %v402_v10 = vld [vmem:[%s3886_s14 + $0x2b8] sm:$0xff] }
  0xdc   : > { %768 = vmatprep.mubr.f32.mxu0 %v404_v11  ;;  %v401_v11 = vld [vmem:[%s3886_s14 + $0x2b0] sm:$0xff] }
  0xdf   : > { %769 = vmatmul.mubr.f32.gmra.mrb[44].mxu0 %v403_v12  ;;  %v406_v12 = vld [vmem:[%s3886_s14 + $0x2d8] sm:$0xff] }
  0xe0   : > { %773 = vmatprep.mubr.f32.mxu0 %v408_v13  ;;  %v3764_v13 = vmov 1.0  }
  0xe1   : > { %3088 = vmatpush3.msk.msra.mxu1 %vm1128_vm1, %v3764_v13 }
  0xe2   : > { %3385 = vmatprep.subr.bf16.mxu1 %v3761_v0 }
  0xe3   : > { %774 = vmatmul.mubr.f32.gmra.mrb[46].mxu0 %v407_v14  ;;  %v405_v14 = vld [vmem:[%s3886_s14 + $0x2d0] sm:$0xff] }
  0xe4   : > { %778 = vmatprep.mubr.f32.mxu0 %v412_v15  ;;  %v410_v15 = vld [vmem:[%s3886_s14 + $0x2f8] sm:$0xff] }
  0xe7   : > { %779 = vmatmul.mubr.f32.gmra.mrb[48].mxu0 %v411_v16  ;;  %v409_v16 = vld [vmem:[%s3886_s14 + $0x2f0] sm:$0xff] }
  0xe8   : > { %783 = vmatprep.mubr.f32.mxu0 %v416_v17  ;;  %v414_v17 = vld [vmem:[%s3886_s14 + $0x318] sm:$0xff] }
  0xeb   : > { %784 = vmatmul.mubr.f32.gmra.mrb[50].mxu0 %v415_v18  ;;  %v413_v18 = vld [vmem:[%s3886_s14 + $0x310] sm:$0xff] }
  0xec   : > { %788 = vmatprep.mubr.f32.mxu0 %v420_v19  ;;  %v418_v19 = vld [vmem:[%s3886_s14 + $0x338] sm:$0xff] }
  0xef   : > { %789 = vmatmul.mubr.f32.gmra.mrb[52].mxu0 %v419_v20  ;;  %v417_v20 = vld [vmem:[%s3886_s14 + $0x330] sm:$0xff] }
  0xf0   : > { %793 = vmatprep.mubr.f32.mxu0 %v424_v21  ;;  %v422_v21 = vld [vmem:[%s3886_s14 + $0x358] sm:$0xff] }
  0xf3   : > { %794 = vmatmul.mubr.f32.gmra.mrb[54].mxu0 %v423_v22  ;;  %v421_v22 = vld [vmem:[%s3886_s14 + $0x350] sm:$0xff] }
  0xf4   : > { %798 = vmatprep.mubr.f32.mxu0 %v428_v23  ;;  %v426_v23 = vld [vmem:[%s3886_s14 + $0x378] sm:$0xff] }
  0xf7   : > { %799 = vmatmul.mubr.f32.gmra.mrb[56].mxu0 %v427_v24  ;;  %v425_v24 = vld [vmem:[%s3886_s14 + $0x370] sm:$0xff] }
  0xf8   : > { %803 = vmatprep.mubr.f32.mxu0 %v432_v25  ;;  %v430_v25 = vld [vmem:[%s3886_s14 + $0x398] sm:$0xff] }
  0xfb   : > { %804 = vmatmul.mubr.f32.gmra.mrb[58].mxu0 %v431_v26  ;;  %v429_v26 = vld [vmem:[%s3886_s14 + $0x390] sm:$0xff] }
  0xfc   : > { %808 = vmatprep.mubr.f32.mxu0 %v436_v27  ;;  %v434_v27 = vld [vmem:[%s3886_s14 + $0x3b8] sm:$0xff] }
  0xff   : > { %809 = vmatmul.mubr.f32.gmra.mrb[60].mxu0 %v435_v28  ;;  %v433_v28 = vld [vmem:[%s3886_s14 + $0x3b0] sm:$0xff] }
 0x100   : > { %2887 = vmatprep.mubr.msk.f32.mxu0 %vm500_vm0, %v318_v30  ;;  %v438_v30 = vld [vmem:[%s3886_s14 + $0x3d8] sm:$0xff] }
 0x103   : > { %879 = vmatmul.mubr.f32.vlgmr.msra.gmra.mrb[0].mxu0 %v317_v31  ;;  %v437_v31 = vld [vmem:[%s3886_s14 + $0x3d0] sm:$0xff]  ;;  %s4684_s14 = smul.u32 31, %s3811_s19 }
 0x104   : > { %2888 = vmatprep.mubr.msk.f32.mxu0 %vm500_vm0, %v322_v32 }
 0x105   : > { %p287_p7 = scmp.lt.s32.totalorder %s4684_s14, 60  ;;  %s2510_s10 = ssub.s32 (%p3832_p8), 61, %s4684_s14 }
 0x106   : > { %p2511_p11 = scmp.lt.s32.totalorder (%p3832_p8), %s2510_s10, 31 }
 0x107   : > { %884 = vmatmul.mubr.f32.gmra.mrb[2].mxu0 %v321_v33  ;;  %s4696_s7 = scalar_select %p287_p7, %s4684_s14, 60 }
 0x108   : > { %2889 = vmatprep.mubr.msk.f32.mxu0 %vm500_vm0, %v326_v34 }
 0x109   : > { %s2885_s8 = sshll.u32 %s4696_s7, 3 }
 0x10a   : > { %s4712_s18 = scalar_lea.vmem %s5173_s2, %s2885_s8  ;;  %s4723_s9 = scalar_lea.vmem %s5174_s3, %s2885_s8 }
 0x10b   : > { %889 = vmatmul.mubr.f32.gmra.mrb[4].mxu0 %v325_v35 }
 0x10c   : > { %2890 = vmatprep.mubr.msk.f32.mxu0 %vm500_vm0, %v330_v36 }
 0x10f   : > { %894 = vmatmul.mubr.f32.gmra.mrb[6].mxu0 %v329_v37 }
 0x110   : > { %2891 = vmatprep.mubr.msk.f32.mxu0 %vm500_vm0, %v334_v38 }
 0x113   : > { %899 = vmatmul.mubr.f32.gmra.mrb[8].mxu0 %v333_v39 }
 0x114   : > { %2892 = vmatprep.mubr.msk.f32.mxu0 %vm500_vm0, %v338_v40 }
 0x117   : > { %904 = vmatmul.mubr.f32.gmra.mrb[10].mxu0 %v337_v41 }
 0x118   : > { %2893 = vmatprep.mubr.msk.f32.mxu0 %vm500_vm0, %v342_v42 }
 0x11b   : > { %909 = vmatmul.mubr.f32.gmra.mrb[12].mxu0 %v341_v43 }
 0x11c   : > { %2894 = vmatprep.mubr.msk.f32.mxu0 %vm500_vm0, %v346_v44 }
 0x11f   : > { %914 = vmatmul.mubr.f32.gmra.mrb[14].mxu0 %v345_v45 }
 0x120   : > { %2895 = vmatprep.mubr.msk.f32.mxu0 %vm500_vm0, %v350_v46 }
 0x123   : > { %919 = vmatmul.mubr.f32.gmra.mrb[16].mxu0 %v349_v47 }
 0x124   : > { %2896 = vmatprep.mubr.msk.f32.mxu0 %vm500_vm0, %v354_v48 }
 0x127   : > { %924 = vmatmul.mubr.f32.gmra.mrb[18].mxu0 %v353_v49 }
 0x128   : > { %2897 = vmatprep.mubr.msk.f32.mxu0 %vm500_vm0, %v358_v50 }
 0x12b   : > { %929 = vmatmul.mubr.f32.gmra.mrb[20].mxu0 %v357_v51 }
 0x12c   : > { %2898 = vmatprep.mubr.msk.f32.mxu0 %vm500_vm0, %v362_v52 }
 0x12f   : > { %934 = vmatmul.mubr.f32.gmra.mrb[22].mxu0 %v361_v53 }
 0x130   : > { %2899 = vmatprep.mubr.msk.f32.mxu0 %vm500_vm0, %v366_v54 }
 0x133   : > { %939 = vmatmul.mubr.f32.gmra.mrb[24].mxu0 %v365_v55 }
 0x134   : > { %2900 = vmatprep.mubr.msk.f32.mxu0 %vm500_vm0, %v370_v56 }
 0x137   : > { %944 = vmatmul.mubr.f32.gmra.mrb[26].mxu0 %v369_v57 }
 0x138   : > { %2901 = vmatprep.mubr.msk.f32.mxu0 %vm500_vm0, %v374_v58 }
 0x13b   : > { %949 = vmatmul.mubr.f32.gmra.mrb[28].mxu0 %v373_v60 }
 0x13c   : > { %2902 = vmatprep.mubr.msk.f32.mxu0 %vm500_vm0, %v378_v61 }
 0x13f   : > { %954 = vmatmul.mubr.f32.gmra.mrb[30].mxu0 %v377_v62 }
 0x140   : > { %2903 = vmatprep.mubr.msk.f32.mxu0 %vm500_vm0, %v382_v63 }
 0x143   : > { %959 = vmatmul.mubr.f32.gmra.mrb[32].mxu0 %v381_v1 }
 0x144   : > { %2904 = vmatprep.mubr.msk.f32.mxu0 %vm500_vm0, %v386_v2 }
 0x147   : > { %964 = vmatmul.mubr.f32.gmra.mrb[34].mxu0 %v385_v3 }
 0x148   : > { %2905 = vmatprep.mubr.msk.f32.mxu0 %vm500_vm0, %v390_v4 }
 0x14b   : > { %969 = vmatmul.mubr.f32.gmra.mrb[36].mxu0 %v389_v5 }
 0x14c   : > { %2906 = vmatprep.mubr.msk.f32.mxu0 %vm500_vm0, %v394_v6 }
 0x14f   : > { %974 = vmatmul.mubr.f32.gmra.mrb[38].mxu0 %v393_v7 }
 0x150   : > { %2907 = vmatprep.mubr.msk.f32.mxu0 %vm500_vm0, %v398_v8 }
 0x153   : > { %979 = vmatmul.mubr.f32.gmra.mrb[40].mxu0 %v397_v9 }
 0x154   : > { %2908 = vmatprep.mubr.msk.f32.mxu0 %vm500_vm0, %v402_v10 }
 0x157   : > { %984 = vmatmul.mubr.f32.gmra.mrb[42].mxu0 %v401_v11 }
 0x158   : > { %2909 = vmatprep.mubr.msk.f32.mxu0 %vm500_vm0, %v406_v12 }
 0x15b   : > { %989 = vmatmul.mubr.f32.gmra.mrb[44].mxu0 %v405_v14 }
 0x15c   : > { %2910 = vmatprep.mubr.msk.f32.mxu0 %vm500_vm0, %v410_v15 }
 0x15f   : > { %994 = vmatmul.mubr.f32.gmra.mrb[46].mxu0 %v409_v16 }
 0x160   : > { %2911 = vmatprep.mubr.msk.f32.mxu0 %vm500_vm0, %v414_v17 }
 0x163   : > { %999 = vmatmul.mubr.f32.gmra.mrb[48].mxu0 %v413_v18 }
 0x164   : > { %2912 = vmatprep.mubr.msk.f32.mxu0 %vm500_vm0, %v418_v19 }
 0x167   : > { %1004 = vmatmul.mubr.f32.gmra.mrb[50].mxu0 %v417_v20 }
 0x168   : > { %2913 = vmatprep.mubr.msk.f32.mxu0 %vm500_vm0, %v422_v21 }
 0x16b   : > { %1009 = vmatmul.mubr.f32.gmra.mrb[52].mxu0 %v421_v22 }
 0x16c   : > { %2914 = vmatprep.mubr.msk.f32.mxu0 %vm500_vm0, %v426_v23 }
 0x16f   : > { %1014 = vmatmul.mubr.f32.gmra.mrb[54].mxu0 %v425_v24 }
 0x170   : > { %2915 = vmatprep.mubr.msk.f32.mxu0 %vm500_vm0, %v430_v25 }
 0x173   : > { %1019 = vmatmul.mubr.f32.gmra.mrb[56].mxu0 %v429_v26 }
 0x174   : > { %2916 = vmatprep.mubr.msk.f32.mxu0 %vm500_vm0, %v434_v27 }
 0x177   : > { %1024 = vmatmul.mubr.f32.gmra.mrb[58].mxu0 %v433_v28 }
 0x178   : > { %2917 = vmatprep.mubr.msk.f32.mxu0 %vm500_vm0, %v438_v30 }
 0x17b   : > { %1029 = vmatmul.mubr.f32.gmra.mrb[60].mxu0 %v437_v31 }
 0x1d6   : > { %v4273_v32 = vpop.f32.mrb[0].mxu0 }
 0x1d7   : > { %v882_v33 = vpop.f32.mrb[1].mxu0  ;;  %3090 = vmatmul.mubr.msk.f32.vlgmr.msra.gmra.mrb[0].mxu1 %vm1034_vm3, %v4273_v32  ;;  %v1383_v31 = vmul.f32 %v4273_v32, %v4273_v32 }
 0x1d8   : > { %3386 = vmatpush3.bf16.msra.mxu1 %v3763_v29  ;;  %3092 = vmatprep.mubr.msk.f32.mxu1 %vm3765_vm2, %v3762_v59 }
 0x1d9   : > { %3387 = vmatprep.subr.bf16.mxu1 %v3761_v0 }
 0x1da   : > { %v4281_v34 = vpop.f32.mrb[2].mxu0 }
 0x1db   : > { %v887_v35 = vpop.f32.mrb[3].mxu0  ;;  %3093 = vmatmul.mubr.msk.f32.gmra.mrb[2].mxu1 %vm1034_vm3, %v4281_v34  ;;  %v1384_v33 = vmul.f32 %v4281_v34, %v4281_v34 }
 0x1dc   : > { %3095 = vmatprep.mubr.msk.f32.mxu1 %vm3765_vm2, %v3762_v59  ;;  %3388 = vmatpush3.bf16.msra.mxu1 %v3763_v29 }
 0x1dd   : > { %3389 = vmatprep.subr.bf16.mxu1 %v3761_v0 }
 0x1de   : > { %v4289_v36 = vpop.f32.mrb[4].mxu0 }
 0x1df   : > { %v892_v37 = vpop.f32.mrb[5].mxu0  ;;  %3096 = vmatmul.mubr.msk.f32.gmra.mrb[4].mxu1 %vm1034_vm3, %v4289_v36  ;;  %v1385_v35 = vmul.f32 %v4289_v36, %v4289_v36 }
 0x1e0   : > { %3098 = vmatprep.mubr.msk.f32.mxu1 %vm3765_vm2, %v3762_v59  ;;  %3390 = vmatpush3.bf16.msra.mxu1 %v3763_v29 }
 0x1e1   : > { %3194 = vmatprep.subr.mxu1 %v3762_v59 }
 0x1e2   : > { %v4297_v38 = vpop.f32.mrb[6].mxu0 }
 0x1e3   : > { %v897_v39 = vpop.f32.mrb[7].mxu0  ;;  %3099 = vmatmul.mubr.msk.f32.gmra.mrb[6].mxu1 %vm1034_vm3, %v4297_v38  ;;  %v1386_v37 = vmul.f32 %v4297_v38, %v4297_v38 }
 0x1e4   : > { %3101 = vmatprep.mubr.msk.f32.mxu1 %vm3765_vm2, %v3762_v59  ;;  %3195 = vmatpush3.msk.msra.mxu1 %vm1128_vm1, %v3764_v13 }
 0x1e6   : > { %v4305_v0 = vpop.f32.mrb[8].mxu0 }
 0x1e7   : > { %v902_v40 = vpop.f32.mrb[9].mxu0  ;;  %3102 = vmatmul.mubr.msk.f32.gmra.mrb[8].mxu1 %vm1034_vm3, %v4305_v0  ;;  %v1387_v39 = vmul.f32 %v4305_v0, %v4305_v0 }
 0x1e8   : > { %3104 = vmatprep.mubr.msk.f32.mxu1 %vm3765_vm2, %v3762_v59 }
 0x1ea   : > { %v4311_v29 = vpop.f32.mrb[10].mxu0 }
 0x1eb   : > { %v907_v41 = vpop.f32.mrb[11].mxu0  ;;  %3105 = vmatmul.mubr.msk.f32.gmra.mrb[10].mxu1 %vm1034_vm3, %v4311_v29  ;;  %v1388_v40 = vmul.f32 %v4311_v29, %v4311_v29 }
 0x1ec   : > { %3107 = vmatprep.mubr.msk.f32.mxu1 %vm3765_vm2, %v3762_v59 }
 0x1ee   : > { %v4317_v42 = vpop.f32.mrb[12].mxu0 }
 0x1ef   : > { %v912_v43 = vpop.f32.mrb[13].mxu0  ;;  %3108 = vmatmul.mubr.msk.f32.gmra.mrb[12].mxu1 %vm1034_vm3, %v4317_v42  ;;  %v1389_v41 = vmul.f32 %v4317_v42, %v4317_v42 }
 0x1f0   : > { %3110 = vmatprep.mubr.msk.f32.mxu1 %vm3765_vm2, %v3762_v59 }
 0x1f2   : > { %v4323_v44 = vpop.f32.mrb[14].mxu0 }
 0x1f3   : > { %v917_v45 = vpop.f32.mrb[15].mxu0  ;;  %3111 = vmatmul.mubr.msk.f32.gmra.mrb[14].mxu1 %vm1034_vm3, %v4323_v44  ;;  %v1390_v43 = vmul.f32 %v4323_v44, %v4323_v44 }
 0x1f4   : > { %3113 = vmatprep.mubr.msk.f32.mxu1 %vm3765_vm2, %v3762_v59 }
 0x1f6   : > { %v4329_v46 = vpop.f32.mrb[16].mxu0 }
 0x1f7   : > { %v922_v47 = vpop.f32.mrb[17].mxu0  ;;  %3114 = vmatmul.mubr.msk.f32.gmra.mrb[16].mxu1 %vm1034_vm3, %v4329_v46  ;;  %v1391_v45 = vmul.f32 %v4329_v46, %v4329_v46 }
 0x1f8   : > { %3116 = vmatprep.mubr.msk.f32.mxu1 %vm3765_vm2, %v3762_v59 }
 0x1fa   : > { %v4335_v48 = vpop.f32.mrb[18].mxu0 }
 0x1fb   : > { %v927_v49 = vpop.f32.mrb[19].mxu0  ;;  %3117 = vmatmul.mubr.msk.f32.gmra.mrb[18].mxu1 %vm1034_vm3, %v4335_v48  ;;  %v1392_v47 = vmul.f32 %v4335_v48, %v4335_v48 }
 0x1fc   : > { %3119 = vmatprep.mubr.msk.f32.mxu1 %vm3765_vm2, %v3762_v59 }
 0x1fe   : > { %v4341_v50 = vpop.f32.mrb[20].mxu0 }
 0x1ff   : > { %v932_v51 = vpop.f32.mrb[21].mxu0  ;;  %3120 = vmatmul.mubr.msk.f32.gmra.mrb[20].mxu1 %vm1034_vm3, %v4341_v50  ;;  %v1393_v49 = vmul.f32 %v4341_v50, %v4341_v50 }
 0x200   : > { %3122 = vmatprep.mubr.msk.f32.mxu1 %vm3765_vm2, %v3762_v59 }
 0x202   : > { %v4347_v52 = vpop.f32.mrb[22].mxu0 }
 0x203   : > { %v937_v53 = vpop.f32.mrb[23].mxu0  ;;  %3123 = vmatmul.mubr.msk.f32.gmra.mrb[22].mxu1 %vm1034_vm3, %v4347_v52  ;;  %v1394_v51 = vmul.f32 %v4347_v52, %v4347_v52 }
 0x204   : > { %3125 = vmatprep.mubr.msk.f32.mxu1 %vm3765_vm2, %v3762_v59 }
 0x206   : > { %v4353_v54 = vpop.f32.mrb[24].mxu0 }
 0x207   : > { %v942_v55 = vpop.f32.mrb[25].mxu0  ;;  %3126 = vmatmul.mubr.msk.f32.gmra.mrb[24].mxu1 %vm1034_vm3, %v4353_v54  ;;  %v1395_v53 = vmul.f32 %v4353_v54, %v4353_v54 }
 0x208   : > { %3128 = vmatprep.mubr.msk.f32.mxu1 %vm3765_vm2, %v3762_v59 }
 0x20a   : > { %v4359_v56 = vpop.f32.mrb[26].mxu0 }
 0x20b   : > { %5196 = vst [vmem:[#allocation6_spill] sm:$0xff] %v4359_v56  ;;  %v947_v57 = vpop.f32.mrb[27].mxu0  ;;  %3129 = vmatmul.mubr.msk.f32.gmra.mrb[26].mxu1 %vm1034_vm3, %v4359_v56  ;;  %v1396_v55 = vmul.f32 %v4359_v56, %v4359_v56  ;;  %v1853_v56 = vld [vmem:[%s4712_s18 + $0x10] sm:$0xff] }
 0x20c   : > { %3131 = vmatprep.mubr.msk.f32.mxu1 %vm3765_vm2, %v3762_v59 }
 0x20e   : > { %v4365_v58 = vpop.f32.mrb[28].mxu0 }
 0x20f   : > { %5197 = vst [vmem:[#allocation7_spill] sm:$0xff] %v4365_v58  ;;  %v952_v60 = vpop.f32.mrb[29].mxu0  ;;  %3132 = vmatmul.mubr.msk.f32.gmra.mrb[28].mxu1 %vm1034_vm3, %v4365_v58  ;;  %v1397_v57 = vmul.f32 %v4365_v58, %v4365_v58 }
 0x210   : > { %3134 = vmatprep.mubr.msk.f32.mxu1 %vm3765_vm2, %v3762_v59 }
 0x212   : > { %v4371_v61 = vpop.f32.mrb[30].mxu0 }
 0x213   : > { %5198 = vst [vmem:[#allocation8_spill] sm:$0xff] %v4371_v61  ;;  %v957_v62 = vpop.f32.mrb[31].mxu0  ;;  %3135 = vmatmul.mubr.msk.f32.gmra.mrb[30].mxu1 %vm1034_vm3, %v4371_v61  ;;  %v1398_v60 = vmul.f32 %v4371_v61, %v4371_v61 }
 0x214   : > { %3137 = vmatprep.mubr.msk.f32.mxu1 %vm3765_vm2, %v3762_v59 }
 0x216   : > { %v4377_v63 = vpop.f32.mrb[32].mxu0 }
 0x217   : > { %5199 = vst [vmem:[#allocation9_spill] sm:$0xff] %v4377_v63  ;;  %v962_v1 = vpop.f32.mrb[33].mxu0  ;;  %3138 = vmatmul.mubr.msk.f32.gmra.mrb[32].mxu1 %vm1034_vm3, %v4377_v63  ;;  %v1399_v62 = vmul.f32 %v4377_v63, %v4377_v63 }
 0x218   : > { %3140 = vmatprep.mubr.msk.f32.mxu1 %vm3765_vm2, %v3762_v59 }
 0x21a   : > { %v4383_v2 = vpop.f32.mrb[34].mxu0 }
 0x21b   : > { %5200 = vst [vmem:[#allocation10_spill] sm:$0xff] %v4383_v2  ;;  %v967_v3 = vpop.f32.mrb[35].mxu0  ;;  %3141 = vmatmul.mubr.msk.f32.gmra.mrb[34].mxu1 %vm1034_vm3, %v4383_v2  ;;  %v1400_v1 = vmul.f32 %v4383_v2, %v4383_v2 }
 0x21c   : > { %3143 = vmatprep.mubr.msk.f32.mxu1 %vm3765_vm2, %v3762_v59 }
 0x21e   : > { %v4389_v4 = vpop.f32.mrb[36].mxu0 }
 0x21f   : > { %5201 = vst [vmem:[#allocation11_spill] sm:$0xff] %v4389_v4  ;;  %v972_v5 = vpop.f32.mrb[37].mxu0  ;;  %3144 = vmatmul.mubr.msk.f32.gmra.mrb[36].mxu1 %vm1034_vm3, %v4389_v4  ;;  %v1401_v3 = vmul.f32 %v4389_v4, %v4389_v4 }
 0x220   : > { %3146 = vmatprep.mubr.msk.f32.mxu1 %vm3765_vm2, %v3762_v59 }
 0x222   : > { %v4395_v6 = vpop.f32.mrb[38].mxu0 }
 0x223   : > { %5202 = vst [vmem:[#allocation12_spill] sm:$0xff] %v4395_v6  ;;  %v977_v7 = vpop.f32.mrb[39].mxu0  ;;  %3147 = vmatmul.mubr.msk.f32.gmra.mrb[38].mxu1 %vm1034_vm3, %v4395_v6  ;;  %v1402_v5 = vmul.f32 %v4395_v6, %v4395_v6 }
 0x224   : > { %3149 = vmatprep.mubr.msk.f32.mxu1 %vm3765_vm2, %v3762_v59 }
 0x226   : > { %v4401_v8 = vpop.f32.mrb[40].mxu0 }
 0x227   : > { %5203 = vst [vmem:[#allocation13_spill] sm:$0xff] %v4401_v8  ;;  %v982_v9 = vpop.f32.mrb[41].mxu0  ;;  %3150 = vmatmul.mubr.msk.f32.gmra.mrb[40].mxu1 %vm1034_vm3, %v4401_v8  ;;  %v1403_v7 = vmul.f32 %v4401_v8, %v4401_v8 }
 0x228   : > { %3152 = vmatprep.mubr.msk.f32.mxu1 %vm3765_vm2, %v3762_v59 }
 0x22a   : > { %v4407_v10 = vpop.f32.mrb[42].mxu0 }
 0x22b   : > { %5204 = vst [vmem:[#allocation14_spill] sm:$0xff] %v4407_v10  ;;  %v987_v11 = vpop.f32.mrb[43].mxu0  ;;  %3153 = vmatmul.mubr.msk.f32.gmra.mrb[42].mxu1 %vm1034_vm3, %v4407_v10  ;;  %v1404_v9 = vmul.f32 %v4407_v10, %v4407_v10 }
 0x22c   : > { %3155 = vmatprep.mubr.msk.f32.mxu1 %vm3765_vm2, %v3762_v59 }
 0x22e   : > { %v4413_v12 = vpop.f32.mrb[44].mxu0 }
 0x22f   : > { %5205 = vst [vmem:[#allocation15_spill] sm:$0xff] %v4413_v12  ;;  %v992_v13 = vpop.f32.mrb[45].mxu0  ;;  %3156 = vmatmul.mubr.msk.f32.gmra.mrb[44].mxu1 %vm1034_vm3, %v4413_v12  ;;  %v1405_v11 = vmul.f32 %v4413_v12, %v4413_v12 }
 0x230   : > { %3158 = vmatprep.mubr.msk.f32.mxu1 %vm3765_vm2, %v3762_v59 }
 0x232   : > { %v4419_v14 = vpop.f32.mrb[46].mxu0 }
 0x233   : > { %5206 = vst [vmem:[#allocation16_spill] sm:$0xff] %v4419_v14  ;;  %v997_v15 = vpop.f32.mrb[47].mxu0  ;;  %3159 = vmatmul.mubr.msk.f32.gmra.mrb[46].mxu1 %vm1034_vm3, %v4419_v14 }
 0x234   : > { %3161 = vmatprep.mubr.msk.f32.mxu1 %vm3765_vm2, %v3762_v59 }
 0x236   : > { %v4425_v16 = vpop.f32.mrb[48].mxu0 }
 0x237   : > { %5207 = vst [vmem:[#allocation17_spill] sm:$0xff] %v4425_v16  ;;  %v1002_v17 = vpop.f32.mrb[49].mxu0  ;;  %3162 = vmatmul.mubr.msk.f32.gmra.mrb[48].mxu1 %vm1034_vm3, %v4425_v16 }
 0x238   : > { %3164 = vmatprep.mubr.msk.f32.mxu1 %vm3765_vm2, %v3762_v59  ;;  %v1406_v17 = vmul.f32 %v4419_v14, %v4419_v14 }
 0x23a   : > { %v4431_v18 = vpop.f32.mrb[50].mxu0 }
 0x23b   : > { %5208 = vst [vmem:[#allocation18_spill] sm:$0xff] %v4431_v18  ;;  %v1007_v19 = vpop.f32.mrb[51].mxu0  ;;  %3165 = vmatmul.mubr.msk.f32.gmra.mrb[50].mxu1 %vm1034_vm3, %v4431_v18 }
 0x23c   : > { %3167 = vmatprep.mubr.msk.f32.mxu1 %vm3765_vm2, %v3762_v59 }
 0x23e   : > { %v4437_v20 = vpop.f32.mrb[52].mxu0 }
 0x23f   : > { %5209 = vst [vmem:[#allocation19_spill] sm:$0xff] %v4437_v20  ;;  %v1012_v21 = vpop.f32.mrb[53].mxu0  ;;  %3168 = vmatmul.mubr.msk.f32.gmra.mrb[52].mxu1 %vm1034_vm3, %v4437_v20 }
 0x240   : > { %3170 = vmatprep.mubr.msk.f32.mxu1 %vm3765_vm2, %v3762_v59 }
 0x242   : > { %v4443_v22 = vpop.f32.mrb[54].mxu0 }
 0x243   : > { %5210 = vst [vmem:[#allocation20_spill] sm:$0xff] %v4443_v22  ;;  %v1017_v23 = vpop.f32.mrb[55].mxu0  ;;  %3171 = vmatmul.mubr.msk.f32.gmra.mrb[54].mxu1 %vm1034_vm3, %v4443_v22 }
 0x244   : > { %3173 = vmatprep.mubr.msk.f32.mxu1 %vm3765_vm2, %v3762_v59  ;;  %v1407_v23 = vmul.f32 %v4425_v16, %v4425_v16 }
 0x246   : > { %v4449_v24 = vpop.f32.mrb[56].mxu0 }
 0x247   : > { %5211 = vst [vmem:[#allocation21_spill] sm:$0xff] %v4449_v24  ;;  %v1022_v25 = vpop.f32.mrb[57].mxu0  ;;  %3174 = vmatmul.mubr.msk.f32.gmra.mrb[56].mxu1 %vm1034_vm3, %v4449_v24 }
 0x248   : > { %3176 = vmatprep.mubr.msk.f32.mxu1 %vm3765_vm2, %v3762_v59 }
 0x24a   : > { %v4455_v26 = vpop.f32.mrb[58].mxu0 }
 0x24b   : > { %5212 = vst [vmem:[#allocation22_spill] sm:$0xff] %v4455_v26  ;;  %v1027_v27 = vpop.f32.mrb[59].mxu0  ;;  %3177 = vmatmul.mubr.msk.f32.gmra.mrb[58].mxu1 %vm1034_vm3, %v4455_v26 }
 0x24c   : > { %3179 = vmatprep.mubr.msk.f32.mxu1 %vm3765_vm2, %v3762_v59 }
 0x24e   : > { %v4461_v28 = vpop.f32.mrb[60].mxu0 }
 0x24f   : > { %5213 = vst [vmem:[#allocation23_spill] sm:$0xff] %v4461_v28  ;;  %v1032_v30 = vpop.f32.mrb[61].mxu0  ;;  %3180 = vmatmul.mubr.msk.f32.gmra.mrb[60].mxu1 %vm1034_vm3, %v4461_v28 }
 0x250   : > { %3196 = vmatprep.mubr.msk.f32.mxu1 %vm3765_vm2, %v3762_v59  ;;  %v1408_v30 = vmul.f32 %v4431_v18, %v4431_v18 }
 0x253   : > { %3197 = vmatmul.mubr.msk.f32.vlgmr.msra.gmra.mrb[62].mxu1 %vm1034_vm3, %v1383_v31 }
 0x254   : > { %3199 = vmatprep.mubr.msk.f32.mxu1 %vm3765_vm2, %v3762_v59 }
 0x257   : > { %3200 = vmatmul.mubr.msk.f32.gmra.mrb[64].mxu1 %vm1034_vm3, %v1384_v33 }
 0x258   : > { %3202 = vmatprep.mubr.msk.f32.mxu1 %vm3765_vm2, %v3762_v59 }
 0x25b   : > { %3203 = vmatmul.mubr.msk.f32.gmra.mrb[66].mxu1 %vm1034_vm3, %v1385_v35  ;;  %v1409_v35 = vmul.f32 %v4437_v20, %v4437_v20 }
 0x25c   : > { %3205 = vmatprep.mubr.msk.f32.mxu1 %vm3765_vm2, %v3762_v59 }
 0x25f   : > { %3206 = vmatmul.mubr.msk.f32.gmra.mrb[68].mxu1 %vm1034_vm3, %v1386_v37 }
 0x260   : > { %3208 = vmatprep.mubr.msk.f32.mxu1 %vm3765_vm2, %v3762_v59 }
 0x263   : > { %3209 = vmatmul.mubr.msk.f32.gmra.mrb[70].mxu1 %vm1034_vm3, %v1387_v39 }
 0x264   : > { %3211 = vmatprep.mubr.msk.f32.mxu1 %vm3765_vm2, %v3762_v59 }
 0x267   : > { %3212 = vmatmul.mubr.msk.f32.gmra.mrb[72].mxu1 %vm1034_vm3, %v1388_v40  ;;  %v3766_v40 = vmov 0  }
 0x268   : > { %3214 = vmatprep.mubr.msk.f32.mxu1 %vm3765_vm2, %v3762_v59  ;;  %3562 = vset.pattern.permute.xlu0 %v3766_v40 }
 0x269   : > { %3563 = vset.pattern.permute.xlu1 %v3766_v40 }
 0x26b   : > { %3215 = vmatmul.mubr.msk.f32.gmra.mrb[74].mxu1 %vm1034_vm3, %v1389_v41  ;;  %v1410_v41 = vmul.f32 %v4443_v22, %v4443_v22 }
 0x26c   : > { %3217 = vmatprep.mubr.msk.f32.mxu1 %vm3765_vm2, %v3762_v59 }
 0x26f   : > { %3218 = vmatmul.mubr.msk.f32.gmra.mrb[76].mxu1 %vm1034_vm3, %v1390_v43 }
 0x270   : > { %3220 = vmatprep.mubr.msk.f32.mxu1 %vm3765_vm2, %v3762_v59 }
 0x273   : > { %3221 = vmatmul.mubr.msk.f32.gmra.mrb[78].mxu1 %vm1034_vm3, %v1391_v45 }
 0x274   : > { %3223 = vmatprep.mubr.msk.f32.mxu1 %vm3765_vm2, %v3762_v59 }
 0x277   : > { %3224 = vmatmul.mubr.msk.f32.gmra.mrb[80].mxu1 %vm1034_vm3, %v1392_v47  ;;  %v1411_v47 = vmul.f32 %v4449_v24, %v4449_v24 }
 0x278   : > { %3226 = vmatprep.mubr.msk.f32.mxu1 %vm3765_vm2, %v3762_v59 }
 0x27b   : > { %3227 = vmatmul.mubr.msk.f32.gmra.mrb[82].mxu1 %vm1034_vm3, %v1393_v49 }
 0x27c   : > { %3229 = vmatprep.mubr.msk.f32.mxu1 %vm3765_vm2, %v3762_v59 }
 0x27f   : > { %3230 = vmatmul.mubr.msk.f32.gmra.mrb[84].mxu1 %vm1034_vm3, %v1394_v51 }
 0x280   : > { %3232 = vmatprep.mubr.msk.f32.mxu1 %vm3765_vm2, %v3762_v59 }
 0x283   : > { %3233 = vmatmul.mubr.msk.f32.gmra.mrb[86].mxu1 %vm1034_vm3, %v1395_v53  ;;  %v1412_v53 = vmul.f32 %v4455_v26, %v4455_v26 }
 0x284   : > { %3235 = vmatprep.mubr.msk.f32.mxu1 %vm3765_vm2, %v3762_v59 }
 0x287   : > { %3236 = vmatmul.mubr.msk.f32.gmra.mrb[88].mxu1 %vm1034_vm3, %v1396_v55 }
 0x288   : > { %3238 = vmatprep.mubr.msk.f32.mxu1 %vm3765_vm2, %v3762_v59 }
 0x28b   : > { %3239 = vmatmul.mubr.msk.f32.gmra.mrb[90].mxu1 %vm1034_vm3, %v1397_v57 }
 0x28c   : > { %3241 = vmatprep.mubr.msk.f32.mxu1 %vm3765_vm2, %v3762_v59 }
 0x28f   : > { %3242 = vmatmul.mubr.msk.f32.gmra.mrb[92].mxu1 %vm1034_vm3, %v1398_v60  ;;  %v1413_v60 = vmul.f32 %v4461_v28, %v4461_v28 }
 0x290   : > { %3244 = vmatprep.mubr.msk.f32.mxu1 %vm3765_vm2, %v3762_v59 }
 0x293   : > { %3245 = vmatmul.mubr.msk.f32.gmra.mrb[94].mxu1 %vm1034_vm3, %v1399_v62 }
 0x294   : > { %3247 = vmatprep.mubr.msk.f32.mxu1 %vm3765_vm2, %v3762_v59 }
 0x297   : > { %3248 = vmatmul.mubr.msk.f32.gmra.mrb[96].mxu1 %vm1034_vm3, %v1400_v1 }
 0x298   : > { %3250 = vmatprep.mubr.msk.f32.mxu1 %vm3765_vm2, %v3762_v59 }
 0x29b   : > { %3251 = vmatmul.mubr.msk.f32.gmra.mrb[98].mxu1 %vm1034_vm3, %v1401_v3 }
 0x29c   : > { %3253 = vmatprep.mubr.msk.f32.mxu1 %vm3765_vm2, %v3762_v59 }
 0x29f   : > { %3254 = vmatmul.mubr.msk.f32.gmra.mrb[100].mxu1 %vm1034_vm3, %v1402_v5 }
 0x2a0   : > { %3256 = vmatprep.mubr.msk.f32.mxu1 %vm3765_vm2, %v3762_v59 }
 0x2a3   : > { %3257 = vmatmul.mubr.msk.f32.gmra.mrb[102].mxu1 %vm1034_vm3, %v1403_v7 }
 0x2a4   : > { %3259 = vmatprep.mubr.msk.f32.mxu1 %vm3765_vm2, %v3762_v59 }
 0x2a7   : > { %3260 = vmatmul.mubr.msk.f32.gmra.mrb[104].mxu1 %vm1034_vm3, %v1404_v9 }
 0x2a8   : > { %3262 = vmatprep.mubr.msk.f32.mxu1 %vm3765_vm2, %v3762_v59 }
 0x2aa   : > { %v4579_v13 = vpop.f32.mrb[0].mxu1 }
 0x2ab   : > { %v3091_v15 = vpop.f32.mrb[1].mxu1  ;;  %3263 = vmatmul.mubr.msk.f32.gmra.mrb[106].mxu1 %vm1034_vm3, %v1405_v11  ;;  %v1352_v20 = vmul.f32 0.020408163, %v4579_v13 }
 0x2ac   : > { %3265 = vmatprep.mubr.msk.f32.mxu1 %vm3765_vm2, %v3762_v59 }
 0x2ae   : > { %v4586_v19 = vpop.f32.mrb[2].mxu1 }
 0x2af   : > { %v3094_v21 = vpop.f32.mrb[3].mxu1  ;;  %3266 = vmatmul.mubr.msk.f32.gmra.mrb[108].mxu1 %vm1034_vm3, %v1406_v17  ;;  %v4687_v18 = vmul.f32 0.020408163, %v4586_v19 }
 0x2b0   : > { %3268 = vmatprep.mubr.msk.f32.mxu1 %vm3765_vm2, %v3762_v59 }
 0x2b2   : > { %v4593_v25 = vpop.f32.mrb[4].mxu1 }
 0x2b3   : > { %v3097_v27 = vpop.f32.mrb[5].mxu1  ;;  %3269 = vmatmul.mubr.msk.f32.gmra.mrb[110].mxu1 %vm1034_vm3, %v1407_v23  ;;  %v4693_v13 = vmul.f32 0.020408163, %v4593_v25 }
 0x2b4   : > { %3271 = vmatprep.mubr.msk.f32.mxu1 %vm3765_vm2, %v3762_v59 }
 0x2b6   : > { %v4600_v31 = vpop.f32.mrb[6].mxu1 }
 0x2b7   : > { %v3100_v33 = vpop.f32.mrb[7].mxu1  ;;  %3272 = vmatmul.mubr.msk.f32.gmra.mrb[112].mxu1 %vm1034_vm3, %v1408_v30  ;;  %v4699_v19 = vmul.f32 0.020408163, %v4600_v31 }
 0x2b8   : > { %3274 = vmatprep.mubr.msk.f32.mxu1 %vm3765_vm2, %v3762_v59 }
 0x2ba   : > { %v4607_v37 = vpop.f32.mrb[8].mxu1 }
 0x2bb   : > { %v3103_v39 = vpop.f32.mrb[9].mxu1  ;;  %3275 = vmatmul.mubr.msk.f32.gmra.mrb[114].mxu1 %vm1034_vm3, %v1409_v35 }
 0x2bc   : > { %3277 = vmatprep.mubr.msk.f32.mxu1 %vm3765_vm2, %v3762_v59 }
 0x2be   : > { %v4614_v43 = vpop.f32.mrb[10].mxu1 }
 0x2bf   : > { %v3106_v45 = vpop.f32.mrb[11].mxu1  ;;  %3278 = vmatmul.mubr.msk.f32.gmra.mrb[116].mxu1 %vm1034_vm3, %v1410_v41 }
 0x2c0   : > { %3280 = vmatprep.mubr.msk.f32.mxu1 %vm3765_vm2, %v3762_v59 }
 0x2c2   : > { %v4621_v49 = vpop.f32.mrb[12].mxu1 }
 0x2c3   : > { %v3109_v51 = vpop.f32.mrb[13].mxu1  ;;  %3281 = vmatmul.mubr.msk.f32.gmra.mrb[118].mxu1 %vm1034_vm3, %v1411_v47 }
 0x2c4   : > { %3283 = vmatprep.mubr.msk.f32.mxu1 %vm3765_vm2, %v3762_v59 }
 0x2c6   : > { %v4628_v55 = vpop.f32.mrb[14].mxu1 }
 0x2c7   : > { %v3112_v57 = vpop.f32.mrb[15].mxu1  ;;  %3284 = vmatmul.mubr.msk.f32.gmra.mrb[120].mxu1 %vm1034_vm3, %v1412_v53  ;;  %v4733_v61 = vmul.f32 0.020408163, %v4628_v55 }
 0x2c8   : > { %3286 = vmatprep.mubr.msk.f32.mxu1 %vm3765_vm2, %v3762_v59 }
 0x2ca   : > { %v4635_v62 = vpop.f32.mrb[16].mxu1 }
 0x2cb   : > { %v3115_v1 = vpop.f32.mrb[17].mxu1  ;;  %3287 = vmatmul.mubr.msk.f32.gmra.mrb[122].mxu1 %vm1034_vm3, %v1413_v60 }
 0x2ce   : > { %v4638_v3 = vpop.f32.mrb[18].mxu1 }
 0x2cf   : > { %v3118_v5 = vpop.f32.mrb[19].mxu1 }
 0x2d2   : > { %v4640_v7 = vpop.f32.mrb[20].mxu1 }
 0x2d3   : > { %v3121_v9 = vpop.f32.mrb[21].mxu1 }
 0x2d6   : > { %v4642_v11 = vpop.f32.mrb[22].mxu1 }
 0x2d7   : > { %v3124_v15 = vpop.f32.mrb[23].mxu1 }
 0x2da   : > { %v4644_v17 = vpop.f32.mrb[24].mxu1 }
 0x2db   : > { %v3127_v59 = vpop.f32.mrb[25].mxu1 }
 0x2de   : > { %v4646_v21 = vpop.f32.mrb[26].mxu1 }
 0x2df   : > { %v3130_v23 = vpop.f32.mrb[27].mxu1 }
 0x2e2   : > { %v4648_v27 = vpop.f32.mrb[28].mxu1 }
 0x2e3   : > { %v3133_v30 = vpop.f32.mrb[29].mxu1 }
 0x2e6   : > { %v4650_v33 = vpop.f32.mrb[30].mxu1 }
 0x2e7   : > { %v3136_v35 = vpop.f32.mrb[31].mxu1 }
 0x2ea   : > { %v4652_v39 = vpop.f32.mrb[32].mxu1 }
 0x2eb   : > { %v3139_v40 = vpop.f32.mrb[33].mxu1 }
 0x2ee   : > { %v4654_v41 = vpop.f32.mrb[34].mxu1 }
 0x2ef   : > { %v3142_v45 = vpop.f32.mrb[35].mxu1 }
 0x2f2   : > { %v4656_v47 = vpop.f32.mrb[36].mxu1 }
 0x2f3   : > { %v3145_v51 = vpop.f32.mrb[37].mxu1 }
 0x2f6   : > { %v4658_v53 = vpop.f32.mrb[38].mxu1 }
 0x2f7   : > { %v3148_v57 = vpop.f32.mrb[39].mxu1 }
 0x2fa   : > { %v4660_v60 = vpop.f32.mrb[40].mxu1 }
 0x2fb   : > { %v3151_v1 = vpop.f32.mrb[41].mxu1 }
 0x2fe   : > { %v4662_v5 = vpop.f32.mrb[42].mxu1 }
 0x2ff   : > { %v3154_v9 = vpop.f32.mrb[43].mxu1 }
 0x302   : > { %v4664_v15 = vpop.f32.mrb[44].mxu1 }
 0x303   : > { %v3157_v59 = vpop.f32.mrb[45].mxu1 }
 0x306   : > { %v4666_v23 = vpop.f32.mrb[46].mxu1 }
 0x307   : > { %v3160_v30 = vpop.f32.mrb[47].mxu1 }
 0x30a   : > { %v4668_v35 = vpop.f32.mrb[48].mxu1 }
 0x30b   : > { %v3163_v40 = vpop.f32.mrb[49].mxu1 }
 0x30e   : > { %v4670_v45 = vpop.f32.mrb[50].mxu1 }
 0x30f   : > { %v3166_v51 = vpop.f32.mrb[51].mxu1 }
 0x312   : > { %v4672_v57 = vpop.f32.mrb[52].mxu1 }
 0x313   : > { %v3169_v28 = vpop.f32.mrb[53].mxu1 }
 0x314   : > { %v1758_v28 = vmul.f32 %v1352_v20, %v1352_v20 }
 0x316   : > { %v4674_v1 = vpop.f32.mrb[54].mxu1 }
 0x317   : > { %v3172_v26 = vpop.f32.mrb[55].mxu1 }
 0x31a   : > { %v4676_v9 = vpop.f32.mrb[56].mxu1 }
 0x31b   : > { %v3175_v24 = vpop.f32.mrb[57].mxu1 }
 0x31e   : > { %v4678_v59 = vpop.f32.mrb[58].mxu1 }
 0x31f   : > { %v3178_v22 = vpop.f32.mrb[59].mxu1 }
 0x320   : > { %v1759_v22 = vmul.f32 %v4687_v18, %v4687_v18 }
 0x322   : > { %v4680_v30 = vpop.f32.mrb[60].mxu1 }
 0x323   : > { %v3181_v40 = vpop.f32.mrb[61].mxu1 }
 0x326   : > { %v1573_v51 = vpop.f32.mrb[62].mxu1 }
 0x327   : > { %v1727_v26 = vmul.f32 0.020408163, %v1573_v51  ;;  %v3198_v16 = vpop.f32.mrb[63].mxu1  ;;  %v1760_v51 = vmul.f32 %v4693_v13, %v4693_v13 }
 0x329   : > { %v1789_v24 = vsub.f32 %v1727_v26, %v1758_v28 }
 0x32a   : > { %v1578_v14 = vpop.f32.mrb[64].mxu1 }
 0x32b   : > { %v1820_v40 = vmax.f32 %v1789_v24, 0.0  ;;  %v1728_v12 = vmul.f32 0.020408163, %v1578_v14  ;;  %v3201_v10 = vpop.f32.mrb[65].mxu1  ;;  %v4707_v14 = vmul.f32 0.020408163, %v4607_v37 }
 0x32c   : > { %v1761_v10 = vmul.f32 %v4699_v19, %v4699_v19 }
 0x32d   : > { %v1882_v8 = vadd.f32 1e-05, %v1820_v40  ;;  %v1790_v6 = vsub.f32 %v1728_v12, %v1759_v22  ;;  %v1762_v37 = vmul.f32 %v4707_v14, %v4707_v14 }
 0x32e   : > { %v1583_v16 = vpop.f32.mrb[66].mxu1 }
 0x32f   : > { %3564 = vrsqrt.f32 %v1882_v8  ;;  %v1821_v28 = vmax.f32 %v1790_v6, 0.0  ;;  %v1729_v26 = vmul.f32 0.020408163, %v1583_v16  ;;  %v3204_v25 = vpop.f32.mrb[67].mxu1  ;;  %v4715_v16 = vmul.f32 0.020408163, %v4614_v43 }
 0x330   : > { %v1851_v25 = vld [vmem:[%s4712_s18] sm:$0xff] }
 0x331   : > { %v1883_v4 = vadd.f32 1e-05, %v1821_v28  ;;  %v1791_v24 = vsub.f32 %v1729_v26, %v1760_v51 }
 0x332   : > { %v1588_v12 = vpop.f32.mrb[68].mxu1 }
 0x333   : > { %3566 = vrsqrt.f32 %v1883_v4  ;;  %v1822_v31 = vmax.f32 %v1791_v24, 0.0  ;;  %v1730_v22 = vmul.f32 0.020408163, %v1588_v12  ;;  %v3207_v40 = vpop.f32.mrb[69].mxu1  ;;  %v1763_v12 = vmul.f32 %v4715_v16, %v4715_v16 }
 0x334   : > { %v1975_v40 = vld [vmem:[%s4723_s9] sm:$0xff] }
 0x335   : > { %v1884_v6 = vadd.f32 1e-05, %v1822_v31  ;;  %v1792_v8 = vsub.f32 %v1730_v22, %v1761_v10 }
 0x336   : > { %v1593_v51 = vpop.f32.mrb[70].mxu1 }
 0x337   : > { %3568 = vrsqrt.f32 %v1884_v6  ;;  %v1823_v4 = vmax.f32 %v1792_v8, 0.0  ;;  %v1731_v28 = vmul.f32 0.020408163, %v1593_v51  ;;  %v3210_v26 = vpop.f32.mrb[71].mxu1  ;;  %v1852_v6 = vld [vmem:[%s4712_s18 + $0x8] sm:$0xff] }
 0x338   : > { %v4730_v8 = vmul.f32 0.020408163, %v4621_v49 }
 0x339   : > { %v3565_v24 = vpop.eup %3564  ;;  %v1885_v10 = vadd.f32 1e-05, %v1823_v4  ;;  %v1793_v43 = vsub.f32 %v1731_v28, %v1762_v37 }
 0x33a   : > { %v1598_v31 = vpop.f32.mrb[72].mxu1  ;;  %v1944_v22 = vmul.f32 %v3565_v24, %v1851_v25  ;;  %v1764_v49 = vmul.f32 %v4730_v8, %v4730_v8 }
 0x33b   : > { %3570 = vrsqrt.f32 %v1885_v10  ;;  %v1824_v51 = vmax.f32 %v1793_v43, 0.0  ;;  %v1732_v26 = vmul.f32 0.020408163, %v1598_v31  ;;  %v3213_v2 = vpop.f32.mrb[73].mxu1  ;;  %v1976_v31 = vld [vmem:[%s4723_s9 + $0x8] sm:$0xff] }
 0x33c   : > { %2070 = vperm.xlu0 %3562, %v1944_v22   ;;  %v2006_v63 = vmul.f32 %v1944_v22, %v1352_v20 }
 0x33d   : > { %v3567_v4 = vpop.eup %3566  ;;  %v1886_v37 = vadd.f32 1e-05, %v1824_v51  ;;  %v1794_v28 = vsub.f32 %v1732_v26, %v1763_v12  ;;  %v1854_v26 = vld [vmem:[%s4712_s18 + $0x18] sm:$0xff] }
 0x33e   : > { %v1603_v25 = vpop.f32.mrb[74].mxu1  ;;  %v2037_v24 = vsub.f32 %v1975_v40, %v2006_v63  ;;  %v1945_v58 = vmul.f32 %v3567_v4, %v1852_v6  ;;  %v1765_v63 = vmul.f32 %v4733_v61, %v4733_v61  ;;  %v4744_v4 = vmul.f32 0.020408163, %v4635_v62 }
 0x33f   : > { %3572 = vrsqrt.f32 %v1886_v37  ;;  %v1825_v10 = vmax.f32 %v1794_v28, 0.0  ;;  %v1733_v43 = vmul.f32 0.020408163, %v1603_v25  ;;  %v3216_v2 = vpop.f32.mrb[75].mxu1 }
 0x340   : > { %2256 = vperm.xlu1 %3563, %v2037_v24   ;;  %2075 = vperm.xlu0 %3562, %v1945_v58   ;;  %v2007_v20 = vmul.f32 %v1945_v58, %v4687_v18  ;;  %v1766_v62 = vmul.f32 %v4744_v4, %v4744_v4 }
 0x341   : > { %v3569_v12 = vpop.eup %3568  ;;  %v1887_v55 = vadd.f32 1e-05, %v1825_v10  ;;  %v1795_v22 = vsub.f32 %v1733_v43, %v1764_v49  ;;  %v4748_v10 = vmul.f32 0.020408163, %v4638_v3 }
 0x342   : > { %v1608_v40 = vpop.f32.mrb[76].mxu1  ;;  %v2038_v6 = vsub.f32 %v1976_v31, %v2007_v20  ;;  %v1946_v51 = vmul.f32 %v3569_v12, %v1853_v56  ;;  %v1977_v12 = vld [vmem:[%s4723_s9 + $0x10] sm:$0xff] }
 0x343   : > { %3574 = vrsqrt.f32 %v1887_v55  ;;  %v1826_v37 = vmax.f32 %v1795_v22, 0.0  ;;  %v1734_v28 = vmul.f32 0.020408163, %v1608_v40  ;;  %v3219_v25 = vpop.f32.mrb[77].mxu1  ;;  %v1855_v55 = vld [vmem:[%s4712_s18 + $0x20] sm:$0xff]  ;;  %v1767_v40 = vmul.f32 %v4748_v10, %v4748_v10 }
 0x344   : > { %2261 = vperm.xlu0 %3562, %v2038_v6   ;;  %2080 = vperm.xlu1 %3563, %v1946_v51   ;;  %v2008_v58 = vmul.f32 %v1946_v51, %v4693_v13  ;;  %v4760_v25 = vmul.f32 0.020408163, %v4640_v7 }
 0x345   : > { %v3571_v18 = vpop.eup %3570  ;;  %v1888_v24 = vadd.f32 1e-05, %v1826_v37  ;;  %v1796_v49 = vsub.f32 %v1734_v28, %v1765_v63  ;;  %v1978_v37 = vld [vmem:[%s4723_s9 + $0x18] sm:$0xff]  ;;  %v1856_v28 = vld [vmem:[%s4712_s18 + $0x28] sm:$0xff] }
 0x346   : > { %v1613_v56 = vpop.f32.mrb[78].mxu1  ;;  %v1947_v43 = vmul.f32 %v3571_v18, %v1854_v26  ;;  %v2039_v51 = vsub.f32 %v1977_v12, %v2008_v58  ;;  %v4764_v58 = vmul.f32 0.020408163, %v4642_v11 }
 0x347   : > { %3576 = vrsqrt.f32 %v1888_v24  ;;  %v1827_v2 = vmax.f32 %v1796_v49, 0.0  ;;  %v1735_v31 = vmul.f32 0.020408163, %v1613_v56  ;;  %v3222_v20 = vpop.f32.mrb[79].mxu1 }
 0x348   : > { %2085 = vperm.xlu1 %3563, %v1947_v43   ;;  %v2009_v13 = vmul.f32 %v1947_v43, %v4699_v19  ;;  %v1768_v20 = vmul.f32 %v4760_v25, %v4760_v25 }
 0x349   : > { %v3573_v22 = vpop.eup %3572  ;;  %v1889_v63 = vadd.f32 1e-05, %v1827_v2  ;;  %v1797_v3 = vsub.f32 %v1735_v31, %v1766_v62 }
 0x34a   : > { %v1618_v6 = vpop.f32.mrb[80].mxu1  ;;  %v1948_v26 = vmul.f32 %v3573_v22, %v1855_v55  ;;  %v2040_v31 = vsub.f32 %v1978_v37, %v2009_v13  ;;  %v1769_v13 = vmul.f32 %v4764_v58, %v4764_v58 }
 0x34b   : > { %3578 = vrsqrt.f32 %v1889_v63  ;;  %v1828_v18 = vmax.f32 %v1797_v3, 0.0  ;;  %v1736_v24 = vmul.f32 0.020408163, %v1618_v6  ;;  %v3225_v49 = vpop.f32.mrb[81].mxu1  ;;  %v1979_v63 = vld [vmem:[%s4723_s9 + $0x20] sm:$0xff] }
 0x34c   : > { %2266 = vperm.xlu1 %3563, %v2039_v51   ;;  %2090 = vperm.xlu0 %3562, %v1948_v26   ;;  %v2010_v19 = vmul.f32 %v1948_v26, %v4707_v14  ;;  %v1857_v14 = vld [vmem:[%s4712_s18 + $0x30] sm:$0xff] }
 0x34d   : > { %v3575_v56 = vpop.eup %3574  ;;  %v1890_v43 = vadd.f32 1e-05, %v1828_v18  ;;  %v1798_v62 = vsub.f32 %v1736_v24, %v1767_v40  ;;  %v1858_v18 = vld [vmem:[%s4712_s18 + $0x38] sm:$0xff]  ;;  %v4776_v24 = vmul.f32 0.020408163, %v4644_v17 }
 0x34e   : > { %v1623_v2 = vpop.f32.mrb[82].mxu1  ;;  %v1949_v7 = vmul.f32 %v3575_v56, %v1856_v28  ;;  %v2041_v26 = vsub.f32 %v1979_v63, %v2010_v19  ;;  %v1980_v28 = vld [vmem:[%s4723_s9 + $0x28] sm:$0xff]  ;;  %v4780_v19 = vmul.f32 0.020408163, %v4646_v21 }
 0x34f   : > { %3580 = vrsqrt.f32 %v1890_v43  ;;  %v1829_v12 = vmax.f32 %v1798_v62, 0.0  ;;  %v1737_v55 = vmul.f32 0.020408163, %v1623_v2  ;;  %v3228_v22 = vpop.f32.mrb[83].mxu1 }
 0x350   : > { %2271 = vperm.xlu0 %3562, %v2040_v31   ;;  %2095 = vperm.xlu1 %3563, %v1949_v7   ;;  %v2011_v3 = vmul.f32 %v1949_v7, %v4715_v16 }
 0x351   : > { %v3577_v11 = vpop.eup %3576  ;;  %v1891_v40 = vadd.f32 1e-05, %v1829_v12  ;;  %v1799_v6 = vsub.f32 %v1737_v55, %v1768_v20  ;;  %v1770_v12 = vmul.f32 %v4776_v24, %v4776_v24 }
 0x352   : > { %v1628_v51 = vpop.f32.mrb[84].mxu1  ;;  %v1950_v37 = vmul.f32 %v3577_v11, %v1857_v14  ;;  %v2042_v20 = vsub.f32 %v1980_v28, %v2011_v3  ;;  %v1981_v14 = vld [vmem:[%s4723_s9 + $0x30] sm:$0xff]  ;;  %v1771_v3 = vmul.f32 %v4780_v19, %v4780_v19  ;;  %v1860_v28 = vld [vmem:[%s4712_s18 + $0x48] sm:$0xff] }
 0x353   : > { %3582 = vrsqrt.f32 %v1891_v40  ;;  %v1830_v49 = vmax.f32 %v1799_v6, 0.0  ;;  %v1738_v56 = vmul.f32 0.020408163, %v1628_v51  ;;  %v3231_v43 = vpop.f32.mrb[85].mxu1 }
 0x354   : > { %2276 = vperm.xlu1 %3563, %v2041_v26   ;;  %2100 = vperm.xlu0 %3562, %v1950_v37   ;;  %v2012_v16 = vmul.f32 %v1950_v37, %v4730_v8  ;;  %v1859_v8 = vld [vmem:[%s4712_s18 + $0x40] sm:$0xff]  ;;  %v1982_v37 = vld [vmem:[%s4723_s9 + $0x38] sm:$0xff] }
 0x355   : > { %v3579_v62 = vpop.eup %3578  ;;  %v1892_v2 = vadd.f32 1e-05, %v1830_v49  ;;  %v1800_v31 = vsub.f32 %v1738_v56, %v1769_v13 }
 0x356   : > { %v1633_v7 = vpop.f32.mrb[86].mxu1  ;;  %v1951_v17 = vmul.f32 %v3579_v62, %v1858_v18  ;;  %v2043_v51 = vsub.f32 %v1981_v14, %v2012_v16  ;;  %v4792_v18 = vmul.f32 0.020408163, %v4648_v27  ;;  %v4796_v16 = vmul.f32 0.020408163, %v4650_v33 }
 0x357   : > { %3584 = vrsqrt.f32 %v1892_v2  ;;  %v1831_v55 = vmax.f32 %v1800_v31, 0.0  ;;  %v1739_v22 = vmul.f32 0.020408163, %v1633_v7  ;;  %v3234_v63 = vpop.f32.mrb[87].mxu1 }
 0x358   : > { %2281 = vperm.xlu0 %3562, %v2042_v20   ;;  %2105 = vperm.xlu1 %3563, %v1951_v17   ;;  %v2013_v11 = vmul.f32 %v1951_v17, %v4733_v61  ;;  %v1772_v17 = vmul.f32 %v4792_v18, %v4792_v18  ;;  %v1983_v63 = vld [vmem:[%s4723_s9 + $0x40] sm:$0xff] }
 0x359   : > { %v3581_v21 = vpop.eup %3580  ;;  %v1893_v40 = vadd.f32 1e-05, %v1831_v55  ;;  %v1801_v6 = vsub.f32 %v1739_v22, %v1770_v12 }
 0x35a   : > { %v1638_v13 = vpop.f32.mrb[88].mxu1  ;;  %v1952_v26 = vmul.f32 %v3581_v21, %v1859_v8  ;;  %v2044_v20 = vsub.f32 %v1982_v37, %v2013_v11  ;;  %v1773_v11 = vmul.f32 %v4796_v16, %v4796_v16 }
 0x35b   : > { %3586 = vrsqrt.f32 %v1893_v40  ;;  %v1832_v49 = vmax.f32 %v1801_v6, 0.0  ;;  %v1740_v56 = vmul.f32 0.020408163, %v1638_v13  ;;  %v3237_v43 = vpop.f32.mrb[89].mxu1  ;;  %v1984_v13 = vld [vmem:[%s4723_s9 + $0x48] sm:$0xff] }
 0x35c   : > { %2286 = vperm.xlu1 %3563, %v2043_v51   ;;  %2110 = vperm.xlu0 %3562, %v1952_v26   ;;  %v2014_v61 = vmul.f32 %v1952_v26, %v4744_v4  ;;  %v1861_v4 = vld [vmem:[%s4712_s18 + $0x50] sm:$0xff]  ;;  %v1862_v51 = vld [vmem:[%s4712_s18 + $0x58] sm:$0xff]  ;;  %v4808_v26 = vmul.f32 0.020408163, %v4652_v39 }
 0x35d   : > { %v3583_v62 = vpop.eup %3582  ;;  %v1894_v2 = vadd.f32 1e-05, %v1832_v49  ;;  %v1802_v31 = vsub.f32 %v1740_v56, %v1771_v3 }
 0x35e   : > { %v1643_v7 = vpop.f32.mrb[90].mxu1  ;;  %v1953_v27 = vmul.f32 %v3583_v62, %v1860_v28  ;;  %v2045_v6 = vsub.f32 %v1983_v63, %v2014_v61  ;;  %v4812_v61 = vmul.f32 0.020408163, %v4654_v41 }
 0x35f   : > { %3588 = vrsqrt.f32 %v1894_v2  ;;  %v1833_v12 = vmax.f32 %v1802_v31, 0.0  ;;  %v1741_v55 = vmul.f32 0.020408163, %v1643_v7  ;;  %v3240_v22 = vpop.f32.mrb[91].mxu1  ;;  %v1774_v7 = vmul.f32 %v4808_v26, %v4808_v26 }
 0x360   : > { %2291 = vperm.xlu0 %3562, %v2044_v20   ;;  %2115 = vperm.xlu1 %3563, %v1953_v27   ;;  %v2015_v14 = vmul.f32 %v1953_v27, %v4748_v10 }
 0x361   : > { %v3585_v33 = vpop.eup %3584  ;;  %v1895_v8 = vadd.f32 1e-05, %v1833_v12  ;;  %v1803_v21 = vsub.f32 %v1741_v55, %v1772_v17  ;;  %v1985_v12 = vld [vmem:[%s4723_s9 + $0x50] sm:$0xff] }
 0x362   : > { %v1648_v40 = vpop.f32.mrb[92].mxu1  ;;  %v1954_v3 = vmul.f32 %v3585_v33, %v1861_v4  ;;  %v2046_v31 = vsub.f32 %v1984_v13, %v2015_v14  ;;  %v1775_v4 = vmul.f32 %v4812_v61, %v4812_v61 }
 0x363   : > { %3590 = vrsqrt.f32 %v1895_v8  ;;  %v1834_v37 = vmax.f32 %v1803_v21, 0.0  ;;  %v1742_v28 = vmul.f32 0.020408163, %v1648_v40  ;;  %v3243_v49 = vpop.f32.mrb[93].mxu1  ;;  %v1986_v21 = vld [vmem:[%s4723_s9 + $0x58] sm:$0xff] }
 0x364   : > { %2296 = vperm.xlu1 %3563, %v2045_v6   ;;  %2120 = vperm.xlu0 %3562, %v1954_v3   ;;  %v2016_v10 = vmul.f32 %v1954_v3, %v4760_v25  ;;  %v1863_v25 = vld [vmem:[%s4712_s18 + $0x60] sm:$0xff]  ;;  %v4824_v40 = vmul.f32 0.020408163, %v4656_v47  ;;  %v4828_v49 = vmul.f32 0.020408163, %v4658_v53 }
 0x365   : > { %v3587_v56 = vpop.eup %3586  ;;  %v1896_v43 = vadd.f32 1e-05, %v1834_v37  ;;  %v1804_v62 = vsub.f32 %v1742_v28, %v1773_v11  ;;  %v1864_v11 = vld [vmem:[%s4712_s18 + $0x68] sm:$0xff] }
 0x366   : > { %v1653_v2 = vpop.f32.mrb[94].mxu1  ;;  %v1955_v39 = vmul.f32 %v3587_v56, %v1862_v51  ;;  %v2047_v33 = vsub.f32 %v1985_v12, %v2016_v10 }
 0x367   : > { %3592 = vrsqrt.f32 %v1896_v43  ;;  %v1835_v20 = vmax.f32 %v1804_v62, 0.0  ;;  %v1743_v27 = vmul.f32 0.020408163, %v1653_v2  ;;  %v3246_v17 = vpop.f32.mrb[95].mxu1  ;;  %v1776_v43 = vmul.f32 %v4824_v40, %v4824_v40 }
 0x368   : > { %2301 = vperm.xlu0 %3562, %v2046_v31   ;;  %2125 = vperm.xlu1 %3563, %v1955_v39   ;;  %v2017_v55 = vmul.f32 %v1955_v39, %v4764_v58  ;;  %v1987_v39 = vld [vmem:[%s4723_s9 + $0x60] sm:$0xff]  ;;  %v1777_v17 = vmul.f32 %v4828_v49, %v4828_v49 }
 0x369   : > { %v3589_v41 = vpop.eup %3588  ;;  %v1897_v22 = vadd.f32 1e-05, %v1835_v20  ;;  %v1805_v63 = vsub.f32 %v1743_v27, %v1774_v7 }
 0x36a   : > { %v1658_v14 = vpop.f32.mrb[96].mxu1  ;;  %v1956_v8 = vmul.f32 %v3589_v41, %v1863_v25  ;;  %v2048_v56 = vsub.f32 %v1986_v21, %v2017_v55  ;;  %v1988_v41 = vld [vmem:[%s4723_s9 + $0x68] sm:$0xff] }
 0x36b   : > { %3594 = vrsqrt.f32 %v1897_v22  ;;  %v1836_v6 = vmax.f32 %v1805_v63, 0.0  ;;  %v1744_v3 = vmul.f32 0.020408163, %v1658_v14  ;;  %v3249_v13 = vpop.f32.mrb[97].mxu1  ;;  %v1866_v22 = vld [vmem:[%s4712_s18 + $0x78] sm:$0xff] }
 0x36c   : > { %2306 = vperm.xlu1 %3563, %v2047_v33   ;;  %2130 = vperm.xlu0 %3562, %v1956_v8   ;;  %v2018_v58 = vmul.f32 %v1956_v8, %v4776_v24  ;;  %v1865_v24 = vld [vmem:[%s4712_s18 + $0x70] sm:$0xff]  ;;  %v4840_v63 = vmul.f32 0.020408163, %v4660_v60 }
 0x36d   : > { %v3591_v51 = vpop.eup %3590  ;;  %v1898_v37 = vadd.f32 1e-05, %v1836_v6  ;;  %v1806_v28 = vsub.f32 %v1744_v3, %v1775_v4  ;;  %v4844_v6 = vmul.f32 0.020408163, %v4662_v5 }
 0x36e   : > { %v1663_v10 = vpop.f32.mrb[98].mxu1  ;;  %v1957_v47 = vmul.f32 %v3591_v51, %v1864_v11  ;;  %v2049_v25 = vsub.f32 %v1987_v39, %v2018_v58  ;;  %v1778_v58 = vmul.f32 %v4840_v63, %v4840_v63 }
 0x36f   : > { %3596 = vrsqrt.f32 %v1898_v37  ;;  %v1837_v62 = vmax.f32 %v1806_v28, 0.0  ;;  %v1745_v2 = vmul.f32 0.020408163, %v1663_v10  ;;  %v3252_v31 = vpop.f32.mrb[99].mxu1  ;;  %v1989_v10 = vld [vmem:[%s4723_s9 + $0x70] sm:$0xff] }
 0x370   : > { %2311 = vperm.xlu0 %3562, %v2048_v56   ;;  %2135 = vperm.xlu1 %3563, %v1957_v47   ;;  %v2019_v7 = vmul.f32 %v1957_v47, %v4780_v19 }
 0x371   : > { %v3593_v53 = vpop.eup %3592  ;;  %v1899_v20 = vadd.f32 1e-05, %v1837_v62  ;;  %v1807_v27 = vsub.f32 %v1745_v2, %v1776_v43  ;;  %v1779_v62 = vmul.f32 %v4844_v6, %v4844_v6 }
 0x372   : > { %v1668_v12 = vpop.f32.mrb[100].mxu1  ;;  %v1958_v55 = vmul.f32 %v3593_v53, %v1865_v24  ;;  %v2050_v13 = vsub.f32 %v1988_v41, %v2019_v7  ;;  %v1990_v24 = vld [vmem:[%s4723_s9 + $0x78] sm:$0xff]  ;;  %v1868_v7 = vld [vmem:[%s4712_s18 + $0x88] sm:$0xff]  ;;  %v4856_v53 = vmul.f32 0.020408163, %v4664_v15 }
 0x373   : > { %3598 = vrsqrt.f32 %v1899_v20  ;;  %v1838_v4 = vmax.f32 %v1807_v27, 0.0  ;;  %v1746_v14 = vmul.f32 0.020408163, %v1668_v12  ;;  %v3255_v33 = vpop.f32.mrb[101].mxu1  ;;  %v4860_v41 = vmul.f32 0.020408163, %v4666_v23 }
 0x374   : > { %2316 = vperm.xlu1 %3563, %v2049_v25   ;;  %2140 = vperm.xlu0 %3562, %v1958_v55   ;;  %v2020_v19 = vmul.f32 %v1958_v55, %v4792_v18  ;;  %v1867_v18 = vld [vmem:[%s4712_s18 + $0x80] sm:$0xff] }
 0x375   : > { %v3595_v8 = vpop.eup %3594  ;;  %v1900_v21 = vadd.f32 1e-05, %v1838_v4  ;;  %v1808_v11 = vsub.f32 %v1746_v14, %v1777_v17  ;;  %v1780_v14 = vmul.f32 %v4856_v53, %v4856_v53 }
 0x376   : > { %v1673_v3 = vpop.f32.mrb[102].mxu1  ;;  %v1959_v60 = vmul.f32 %v3595_v8, %v1866_v22  ;;  %v2051_v31 = vsub.f32 %v1989_v10, %v2020_v19  ;;  %v1870_v10 = vld [vmem:[%s4712_s18 + $0x98] sm:$0xff] }
 0x377   : > { %3600 = vrsqrt.f32 %v1900_v21  ;;  %v1839_v51 = vmax.f32 %v1808_v11, 0.0  ;;  %v1747_v37 = vmul.f32 0.020408163, %v1673_v3  ;;  %v3258_v28 = vpop.f32.mrb[103].mxu1  ;;  %v1991_v21 = vld [vmem:[%s4723_s9 + $0x80] sm:$0xff] }
 0x378   : > { %2321 = vperm.xlu0 %3562, %v2050_v13   ;;  %2145 = vperm.xlu1 %3563, %v1959_v60   ;;  %v2021_v56 = vmul.f32 %v1959_v60, %v4796_v16  ;;  %v1781_v60 = vmul.f32 %v4860_v41, %v4860_v41  ;;  %v1992_v28 = vld [vmem:[%s4723_s9 + $0x88] sm:$0xff] }
 0x379   : > { %v3597_v5 = vpop.eup %3596  ;;  %v1901_v47 = vadd.f32 1e-05, %v1839_v51  ;;  %v1809_v43 = vsub.f32 %v1747_v37, %v1778_v58 }
 0x37a   : > { %v1678_v2 = vpop.f32.mrb[104].mxu1  ;;  %v1960_v39 = vmul.f32 %v3597_v5, %v1867_v18  ;;  %v2052_v4 = vsub.f32 %v1990_v24, %v2021_v56  ;;  %v4872_v18 = vmul.f32 0.020408163, %v4668_v35 }
 0x37b   : > { %3602 = vrsqrt.f32 %v1901_v47  ;;  %v1840_v20 = vmax.f32 %v1809_v43, 0.0  ;;  %v1748_v27 = vmul.f32 0.020408163, %v1678_v2  ;;  %v3261_v17 = vpop.f32.mrb[105].mxu1 }
 0x37c   : > { %2326 = vperm.xlu1 %3563, %v2051_v31   ;;  %2150 = vperm.xlu0 %3562, %v1960_v39   ;;  %v2022_v16 = vmul.f32 %v1960_v39, %v4808_v26  ;;  %v1869_v26 = vld [vmem:[%s4712_s18 + $0x90] sm:$0xff]  ;;  %v4876_v31 = vmul.f32 0.020408163, %v4670_v45 }
 0x37d   : > { %v3599_v12 = vpop.eup %3598  ;;  %v1902_v25 = vadd.f32 1e-05, %v1840_v20  ;;  %v1810_v55 = vsub.f32 %v1748_v27, %v1779_v62 }
 0x37e   : > { %v1683_v22 = vpop.f32.mrb[106].mxu1  ;;  %v1961_v15 = vmul.f32 %v3599_v12, %v1868_v7  ;;  %v2053_v51 = vsub.f32 %v1991_v21, %v2022_v16  ;;  %v1782_v7 = vmul.f32 %v4872_v18, %v4872_v18  ;;  %v1993_v16 = vld [vmem:[%s4723_s9 + $0x90] sm:$0xff] }
 0x37f   : > { %3604 = vrsqrt.f32 %v1902_v25  ;;  %v1841_v33 = vmax.f32 %v1810_v55, 0.0  ;;  %v1749_v19 = vmul.f32 0.020408163, %v1683_v22  ;;  %v3264_v8 = vpop.f32.mrb[107].mxu1  ;;  %v1783_v22 = vmul.f32 %v4876_v31, %v4876_v31 }
 0x380   : > { %2331 = vperm.xlu0 %3562, %v2052_v4   ;;  %2155 = vperm.xlu1 %3563, %v1961_v15   ;;  %v2023_v11 = vmul.f32 %v1961_v15, %v4812_v61  ;;  %v4888_v8 = vmul.f32 0.020408163, %v4672_v57 }
 0x381   : > { %v3601_v23 = vpop.eup %3600  ;;  %v1903_v3 = vadd.f32 1e-05, %v1841_v33  ;;  %v1811_v13 = vsub.f32 %v1749_v19, %v1780_v14  ;;  %v1994_v33 = vld [vmem:[%s4723_s9 + $0x98] sm:$0xff]  ;;  %v1872_v19 = vld [vmem:[%s4712_s18 + $0xa8] sm:$0xff] }
 0x382   : > { %v1688_v58 = vpop.f32.mrb[108].mxu1  ;;  %v1962_v37 = vmul.f32 %v3601_v23, %v1869_v26  ;;  %v2054_v24 = vsub.f32 %v1992_v28, %v2023_v11 }
 0x383   : > { %3606 = vrsqrt.f32 %v1903_v3  ;;  %v1842_v56 = vmax.f32 %v1811_v13, 0.0  ;;  %v1750_v5 = vmul.f32 0.020408163, %v1688_v58  ;;  %v3267_v47 = vpop.f32.mrb[109].mxu1 }
 0x384   : > { %2336 = vperm.xlu1 %3563, %v2053_v51   ;;  %2160 = vperm.xlu0 %3562, %v1962_v37   ;;  %v2024_v61 = vmul.f32 %v1962_v37, %v4824_v40  ;;  %v1871_v40 = vld [vmem:[%s4712_s18 + $0xa0] sm:$0xff]  ;;  %v1784_v37 = vmul.f32 %v4888_v8, %v4888_v8 }
 0x385   : > { %v3603_v43 = vpop.eup %3602  ;;  %v1904_v62 = vadd.f32 1e-05, %v1842_v56  ;;  %v1812_v2 = vsub.f32 %v1750_v5, %v1781_v60  ;;  %v4892_v60 = vmul.f32 0.020408163, %v4674_v1  ;;  %v1995_v5 = vld [vmem:[%s4723_s9 + $0xa0] sm:$0xff] }
 0x386   : > { %v1693_v39 = vpop.f32.mrb[110].mxu1  ;;  %v1963_v35 = vmul.f32 %v3603_v43, %v1870_v10  ;;  %v2055_v15 = vsub.f32 %v1993_v16, %v2024_v61 }
 0x387   : > { %3608 = vrsqrt.f32 %v1904_v62  ;;  %v1843_v20 = vmax.f32 %v1812_v2, 0.0  ;;  %v1751_v27 = vmul.f32 0.020408163, %v1693_v39  ;;  %v3270_v17 = vpop.f32.mrb[111].mxu1  ;;  %v1785_v62 = vmul.f32 %v4892_v60, %v4892_v60 }
 0x388   : > { %2341 = vperm.xlu0 %3562, %v2054_v24   ;;  %2165 = vperm.xlu1 %3563, %v1963_v35   ;;  %v2025_v12 = vmul.f32 %v1963_v35, %v4828_v49  ;;  %v1996_v35 = vld [vmem:[%s4723_s9 + $0xa8] sm:$0xff] }
 0x389   : > { %v3605_v45 = vpop.eup %3604  ;;  %v1905_v25 = vadd.f32 1e-05, %v1843_v20  ;;  %v1813_v55 = vsub.f32 %v1751_v27, %v1782_v7  ;;  %v1874_v7 = vld [vmem:[%s4712_s18 + $0xb8] sm:$0xff]  ;;  %v4904_v20 = vmul.f32 0.020408163, %v4676_v9 }
 0x38a   : > { %v1698_v4 = vpop.f32.mrb[112].mxu1  ;;  %v1964_v14 = vmul.f32 %v3605_v45, %v1871_v40  ;;  %v2056_v51 = vsub.f32 %v1994_v33, %v2025_v12 }
 0x38b   : > { %3610 = vrsqrt.f32 %v1905_v25  ;;  %v1844_v21 = vmax.f32 %v1813_v55, 0.0  ;;  %v1752_v26 = vmul.f32 0.020408163, %v1698_v4  ;;  %v3273_v11 = vpop.f32.mrb[113].mxu1  ;;  %v4908_v25 = vmul.f32 0.020408163, %v4678_v59 }
 0x38c   : > { %2346 = vperm.xlu1 %3563, %v2055_v15   ;;  %2170 = vperm.xlu0 %3562, %v1964_v14   ;;  %v2026_v49 = vmul.f32 %v1964_v14, %v4840_v63  ;;  %v1873_v63 = vld [vmem:[%s4712_s18 + $0xb0] sm:$0xff]  ;;  %v1786_v4 = vmul.f32 %v4904_v20, %v4904_v20 }
 0x38d   : > { %v3607_v23 = vpop.eup %3606  ;;  %v1906_v3 = vadd.f32 1e-05, %v1844_v21  ;;  %v1814_v13 = vsub.f32 %v1752_v26, %v1783_v22 }
 0x38e   : > { %v1703_v58 = vpop.f32.mrb[114].mxu1  ;;  %v1965_v57 = vmul.f32 %v3607_v23, %v1872_v19  ;;  %v2057_v39 = vsub.f32 %v1995_v5, %v2026_v49  ;;  %v1997_v19 = vld [vmem:[%s4723_s9 + $0xb0] sm:$0xff]  ;;  %v1787_v49 = vmul.f32 %v4908_v25, %v4908_v25 }
 0x38f   : > { %3612 = vrsqrt.f32 %v1906_v3  ;;  %v1845_v28 = vmax.f32 %v1814_v13, 0.0  ;;  %v1753_v10 = vmul.f32 0.020408163, %v1703_v58  ;;  %v3276_v56 = vpop.f32.mrb[115].mxu1  ;;  %v1998_v58 = vld [vmem:[%s4723_s9 + $0xb8] sm:$0xff] }
 0x390   : > { %2351 = vperm.xlu0 %3562, %v2056_v51   ;;  %2175 = vperm.xlu1 %3563, %v1965_v57   ;;  %v2027_v47 = vmul.f32 %v1965_v57, %v4844_v6  ;;  %v1876_v51 = vld [vmem:[%s4712_s18 + $0xc8] sm:$0xff]  ;;  %v4920_v57 = vmul.f32 0.020408163, %v4680_v30 }
 0x391   : > { %v3609_v1 = vpop.eup %3608  ;;  %v1907_v61 = vadd.f32 1e-05, %v1845_v28  ;;  %v1815_v43 = vsub.f32 %v1753_v10, %v1784_v37 }
 0x392   : > { %v1708_v2 = vpop.f32.mrb[116].mxu1  ;;  %v1966_v24 = vmul.f32 %v3609_v1, %v1873_v63  ;;  %v2058_v22 = vsub.f32 %v1996_v35, %v2027_v47  ;;  %v1788_v30 = vmul.f32 %v4920_v57, %v4920_v57 }
 0x393   : > { %3614 = vrsqrt.f32 %v1907_v61  ;;  %v1846_v27 = vmax.f32 %v1815_v43, 0.0  ;;  %v1754_v17 = vmul.f32 0.020408163, %v1708_v2  ;;  %v3279_v16 = vpop.f32.mrb[117].mxu1 }
 0x394   : > { %2356 = vperm.xlu1 %3563, %v2057_v39   ;;  %2180 = vperm.xlu0 %3562, %v1966_v24   ;;  %v2028_v6 = vmul.f32 %v1966_v24, %v4856_v53  ;;  %v1875_v53 = vld [vmem:[%s4712_s18 + $0xc0] sm:$0xff]  ;;  %v1877_v24 = vld [vmem:[%s4712_s18 + $0xd0] sm:$0xff] }
 0x395   : > { %v3611_v40 = vpop.eup %3610  ;;  %v1908_v12 = vadd.f32 1e-05, %v1846_v27  ;;  %v1816_v45 = vsub.f32 %v1754_v17, %v1785_v62  ;;  %v1999_v39 = vld [vmem:[%s4723_s9 + $0xc0] sm:$0xff] }
 0x396   : > { %v1713_v55 = vpop.f32.mrb[118].mxu1  ;;  %v1967_v9 = vmul.f32 %v3611_v40, %v1874_v7  ;;  %v2059_v3 = vsub.f32 %v1997_v19, %v2028_v6  ;;  %v2000_v40 = vld [vmem:[%s4723_s9 + $0xc8] sm:$0xff] }
 0x397   : > { %3616 = vrsqrt.f32 %v1908_v12  ;;  %v1847_v15 = vmax.f32 %v1816_v45, 0.0  ;;  %v1755_v14 = vmul.f32 0.020408163, %v1713_v55  ;;  %v3282_v33 = vpop.f32.mrb[119].mxu1  ;;  %v1878_v12 = vld [vmem:[%s4712_s18 + $0xd8] sm:$0xff] }
 0x398   : > { %2361 = vperm.xlu0 %3562, %v2058_v22   ;;  %2185 = vperm.xlu1 %3563, %v1967_v9   ;;  %v2029_v21 = vmul.f32 %v1967_v9, %v4860_v41 }
 0x399   : > { %v3613_v59 = vpop.eup %3612  ;;  %v1909_v26 = vadd.f32 1e-05, %v1847_v15  ;;  %v1817_v11 = vsub.f32 %v1755_v14, %v1786_v4  ;;  %v2001_v4 = vld [vmem:[%s4723_s9 + $0xd0] sm:$0xff]  ;;  %v1879_v15 = vld [vmem:[%s4712_s18 + $0xe0] sm:$0xff] }
 0x39a   : > { %v1718_v23 = vpop.f32.mrb[120].mxu1  ;;  %v1968_v13 = vmul.f32 %v3613_v59, %v1875_v53  ;;  %v2060_v1 = vsub.f32 %v1998_v58, %v2029_v21  ;;  %v2002_v21 = vld [vmem:[%s4723_s9 + $0xd8] sm:$0xff]  ;;  %v1880_v59 = vld [vmem:[%s4712_s18 + $0xe8] sm:$0xff] }
 0x39b   : > { %3618 = vrsqrt.f32 %v1909_v26  ;;  %v1848_v37 = vmax.f32 %v1817_v11, 0.0  ;;  %v1756_v28 = vmul.f32 0.020408163, %v1718_v23  ;;  %v3285_v10 = vpop.f32.mrb[121].mxu1  ;;  %v2003_v23 = vld [vmem:[%s4723_s9 + $0xe0] sm:$0xff] }
 0x39c   : > { %2366 = vperm.xlu1 %3563, %v2059_v3   ;;  %2190 = vperm.xlu0 %3562, %v1968_v13   ;;  %v2030_v41 = vmul.f32 %v1968_v13, %v4872_v18  ;;  %v1881_v3 = vld [vmem:[%s4712_s18 + $0xf0] sm:$0xff] }
 0x39d   : > { %v3615_v56 = vpop.eup %3614  ;;  %v1910_v5 = vadd.f32 1e-05, %v1848_v37  ;;  %v1818_v63 = vsub.f32 %v1756_v28, %v1787_v49  ;;  %v2004_v37 = vld [vmem:[%s4723_s9 + $0xe8] sm:$0xff]  ;;  %v2005_v28 = vld [vmem:[%s4723_s9 + $0xf0] sm:$0xff] }
 0x39e   : > { %v1723_v47 = vpop.f32.mrb[122].mxu1  ;;  %v1969_v61 = vmul.f32 %v3615_v56, %v1876_v51  ;;  %v2061_v17 = vsub.f32 %v1999_v39, %v2030_v41 }
 0x39f   : > { %3620 = vrsqrt.f32 %v1910_v5  ;;  %v1849_v43 = vmax.f32 %v1818_v63, 0.0  ;;  %v1757_v62 = vmul.f32 0.020408163, %v1723_v47  ;;  %v3288_v2 = vpop.f32.mrb[123].mxu1 }
 0x3a0   : > { %2371 = vperm.xlu0 %3562, %v2060_v1   ;;  %2195 = vperm.xlu1 %3563, %v1969_v61   ;;  %v2031_v18 = vmul.f32 %v1969_v61, %v4876_v31 }
 0x3a1   : > { %v3617_v35 = vpop.eup %3616  ;;  %v1911_v7 = vadd.f32 1e-05, %v1849_v43  ;;  %v1819_v27 = vsub.f32 %v1757_v62, %v1788_v30 }
 0x3a2   : > { %v1970_v16 = vmul.f32 %v3617_v35, %v1877_v24  ;;  %v2062_v31 = vsub.f32 %v2000_v40, %v2031_v18 }
 0x3a3   : > { %3622 = vrsqrt.f32 %v1911_v7  ;;  %v1850_v6 = vmax.f32 %v1819_v27, 0.0 }
 0x3a4   : > { %2376 = vperm.xlu1 %3563, %v2061_v17   ;;  %2200 = vperm.xlu0 %3562, %v1970_v16   ;;  %v2032_v45 = vmul.f32 %v1970_v16, %v4888_v8 }
 0x3a5   : > { %v3619_v55 = vpop.eup %3618  ;;  %v1912_v22 = vadd.f32 1e-05, %v1850_v6 }
 0x3a6   : > { %v1971_v9 = vmul.f32 %v3619_v55, %v1878_v12  ;;  %v2063_v19 = vsub.f32 %v2001_v4, %v2032_v45 }
 0x3a7   : > { %3624 = vrsqrt.f32 %v1912_v22 }
 0x3a8   : > { %2381 = vperm.xlu0 %3562, %v2062_v31   ;;  %2205 = vperm.xlu1 %3563, %v1971_v9   ;;  %v2033_v14 = vmul.f32 %v1971_v9, %v4892_v60 }
 0x3a9   : > { %v3621_v33 = vpop.eup %3620 }
 0x3aa   : > { %v1972_v53 = vmul.f32 %v3621_v33, %v1879_v15  ;;  %v2064_v11 = vsub.f32 %v2002_v21, %v2033_v14 }
 0x3ac   : > { %2386 = vperm.xlu1 %3563, %v2063_v19   ;;  %2210 = vperm.xlu0 %3562, %v1972_v53   ;;  %v2034_v8 = vmul.f32 %v1972_v53, %v4904_v20 }
 0x3ad   : > { %v3623_v26 = vpop.eup %3622 }
 0x3ae   : > { %v1973_v49 = vmul.f32 %v3623_v26, %v1880_v59  ;;  %v2065_v58 = vsub.f32 %v2003_v23, %v2034_v8 }
 0x3b0   : > { %2391 = vperm.xlu0 %3562, %v2064_v11   ;;  %2215 = vperm.xlu1 %3563, %v1973_v49   ;;  %v2035_v60 = vmul.f32 %v1973_v49, %v4908_v25 }
 0x3b1   : > { %v3625_v13 = vpop.eup %3624 }
 0x3b2   : > { %v1974_v51 = vmul.f32 %v3625_v13, %v1881_v3  ;;  %v2066_v20 = vsub.f32 %v2004_v37, %v2035_v60 }
 0x3b4   : > { %2396 = vperm.xlu1 %3563, %v2065_v58   ;;  %2220 = vperm.xlu0 %3562, %v1974_v51   ;;  %v2036_v10 = vmul.f32 %v1974_v51, %v4920_v57 }
 0x3b6   : > { %v2067_v41 = vsub.f32 %v2005_v28, %v2036_v10 }
 0x3b8   : > { %2401 = vperm.xlu0 %3562, %v2066_v20   ;;  %2406 = vperm.xlu1 %3563, %v2067_v41  }
 0x3bb   : > { %v2071_v56 = vpop.permute.xlu0 %2070 }
 0x3bc   : > { %v2223_v5 = vmul.f32 %v2071_v56, %v4273_v32 }
 0x3bf   : > { %v2257_v63 = vpop.permute.xlu1 %2256  ;;  %v2076_v47 = vpop.permute.xlu0 %2075 }
 0x3c0   : > { %v2409_v25 = vadd.f32 %v2257_v63, %v2223_v5  ;;  %v2224_v61 = vmul.f32 %v2076_v47, %v4281_v34 }
 0x3c2   : > { %v2440_v1 = vmax.f32 %v2409_v25, 0.0  ;;  %v5214_v25 = vld [vmem:[#allocation6_spill] sm:$0xff] }
 0x3c3   : > { %v2262_v30 = vpop.permute.xlu0 %2261  ;;  %v2081_v43 = vpop.permute.xlu1 %2080 }
 0x3c4   : > { %2471 = vst.msk [vmem:[%s4946_s15] sm:$0xff] %vm1034_vm3, %v2440_v1  ;;  %v2410_v57 = vadd.f32 %v2262_v30, %v2224_v61  ;;  %v2225_v32 = vmul.f32 %v2081_v43, %v4289_v36 }
 0x3c6   : > { %v2441_v62 = vmax.f32 %v2410_v57, 0.0  ;;  %v5215_v57 = vld [vmem:[#allocation7_spill] sm:$0xff] }
 0x3c7   : > { %v2086_v2 = vpop.permute.xlu1 %2085 }
 0x3c8   : > { %2472 = vst.msk [vmem:[%s4946_s15 + $0x8] sm:$0xff] %vm1034_vm3, %v2441_v62  ;;  %v2226_v18 = vmul.f32 %v2086_v2, %v4297_v38 }
 0x3cb   : > { %v2267_v39 = vpop.permute.xlu1 %2266  ;;  %v2091_v24 = vpop.permute.xlu0 %2090 }
 0x3cc   : > { %v2411_v34 = vadd.f32 %v2267_v39, %v2225_v32  ;;  %v2227_v16 = vmul.f32 %v2091_v24, %v4305_v0  ;;  %v5216_v24 = vld [vmem:[#allocation8_spill] sm:$0xff] }
 0x3ce   : > { %v2442_v35 = vmax.f32 %v2411_v34, 0.0 }
 0x3cf   : > { %v2272_v7 = vpop.permute.xlu0 %2271  ;;  %v2096_v27 = vpop.permute.xlu1 %2095 }
 0x3d0   : > { %2473 = vst.msk [vmem:[%s4946_s15 + $0x10] sm:$0xff] %vm1034_vm3, %v2442_v35  ;;  %v2412_v17 = vadd.f32 %v2272_v7, %v2226_v18  ;;  %v2228_v45 = vmul.f32 %v2096_v27, %v4311_v29 }
 0x3d2   : > { %v2443_v6 = vmax.f32 %v2412_v17, 0.0  ;;  %v5217_v17 = vld [vmem:[#allocation9_spill] sm:$0xff] }
 0x3d3   : > { %v2277_v40 = vpop.permute.xlu1 %2276  ;;  %v2101_v12 = vpop.permute.xlu0 %2100 }
 0x3d4   : > { %2474 = vst.msk [vmem:[%s4946_s15 + $0x18] sm:$0xff] %vm1034_vm3, %v2443_v6  ;;  %v2413_v36 = vadd.f32 %v2277_v40, %v2227_v16  ;;  %v2229_v9 = vmul.f32 %v2101_v12, %v4317_v42 }
 0x3d6   : > { %v2444_v38 = vmax.f32 %v2413_v36, 0.0 }
 0x3d7   : > { %v2282_v55 = vpop.permute.xlu0 %2281  ;;  %v2106_v22 = vpop.permute.xlu1 %2105 }
 0x3d8   : > { %2475 = vst.msk [vmem:[%s4946_s15 + $0x20] sm:$0xff] %vm1034_vm3, %v2444_v38  ;;  %v2414_v31 = vadd.f32 %v2282_v55, %v2228_v45  ;;  %v2230_v33 = vmul.f32 %v2106_v22, %v4323_v44  ;;  %v5218_v45 = vld [vmem:[#allocation10_spill] sm:$0xff] }
 0x3da   : > { %v2445_v0 = vmax.f32 %v2414_v31, 0.0 }
 0x3db   : > { %v2287_v4 = vpop.permute.xlu1 %2286  ;;  %v2111_v15 = vpop.permute.xlu0 %2110 }
 0x3dc   : > { %2476 = vst.msk [vmem:[%s4946_s15 + $0x28] sm:$0xff] %vm1034_vm3, %v2445_v0  ;;  %v2415_v14 = vadd.f32 %v2287_v4, %v2229_v9  ;;  %v2231_v59 = vmul.f32 %v2111_v15, %v4329_v46  ;;  %v5219_v0 = vld [vmem:[#allocation11_spill] sm:$0xff] }
 0x3de   : > { %v2446_v29 = vmax.f32 %v2415_v14, 0.0 }
 0x3df   : > { %v2292_v19 = vpop.permute.xlu0 %2291  ;;  %v2116_v53 = vpop.permute.xlu1 %2115 }
 0x3e0   : > { %2477 = vst.msk [vmem:[%s4946_s15 + $0x30] sm:$0xff] %vm1034_vm3, %v2446_v29  ;;  %v2416_v21 = vadd.f32 %v2292_v19, %v2230_v33  ;;  %v2232_v49 = vmul.f32 %v2116_v53, %v4335_v48  ;;  %v5220_v19 = vld [vmem:[#allocation12_spill] sm:$0xff] }
 0x3e2   : > { %v2447_v42 = vmax.f32 %v2416_v21, 0.0 }
 0x3e3   : > { %v2297_v8 = vpop.permute.xlu1 %2296  ;;  %v2121_v26 = vpop.permute.xlu0 %2120 }
 0x3e4   : > { %2478 = vst.msk [vmem:[%s4946_s15 + $0x38] sm:$0xff] %vm1034_vm3, %v2447_v42  ;;  %v2417_v11 = vadd.f32 %v2297_v8, %v2231_v59  ;;  %v2233_v13 = vmul.f32 %v2121_v26, %v4341_v50  ;;  %v5221_v26 = vld [vmem:[#allocation13_spill] sm:$0xff] }
 0x3e6   : > { %v2448_v44 = vmax.f32 %v2417_v11, 0.0 }
 0x3e7   : > { %v2302_v23 = vpop.permute.xlu0 %2301  ;;  %v2126_v3 = vpop.permute.xlu1 %2125 }
 0x3e8   : > { %2479 = vst.msk [vmem:[%s4946_s15 + $0x40] sm:$0xff] %vm1034_vm3, %v2448_v44  ;;  %v2418_v60 = vadd.f32 %v2302_v23, %v2232_v49  ;;  %v2234_v28 = vmul.f32 %v2126_v3, %v4347_v52 }
 0x3ea   : > { %v2449_v46 = vmax.f32 %v2418_v60, 0.0  ;;  %v5222_v60 = vld [vmem:[#allocation14_spill] sm:$0xff] }
 0x3eb   : > { %v2307_v58 = vpop.permute.xlu1 %2306  ;;  %v2131_v51 = vpop.permute.xlu0 %2130 }
 0x3ec   : > { %2480 = vst.msk [vmem:[%s4946_s15 + $0x48] sm:$0xff] %vm1034_vm3, %v2449_v46  ;;  %v2419_v37 = vadd.f32 %v2307_v58, %v2233_v13  ;;  %v2235_v56 = vmul.f32 %v2131_v51, %v4353_v54 }
 0x3ee   : > { %v2450_v48 = vmax.f32 %v2419_v37, 0.0 }
 0x3ef   : > { %v2312_v10 = vpop.permute.xlu0 %2311  ;;  %v2136_v20 = vpop.permute.xlu1 %2135 }
 0x3f0   : > { %2481 = vst.msk [vmem:[%s4946_s15 + $0x50] sm:$0xff] %vm1034_vm3, %v2450_v48  ;;  %v2420_v41 = vadd.f32 %v2312_v10, %v2234_v28  ;;  %v2236_v1 = vmul.f32 %v2136_v20, %v5214_v25  ;;  %v5223_v28 = vld [vmem:[#allocation15_spill] sm:$0xff] }
 0x3f2   : > { %v2451_v50 = vmax.f32 %v2420_v41, 0.0 }
 0x3f3   : > { %v2317_v5 = vpop.permute.xlu1 %2316  ;;  %v2141_v63 = vpop.permute.xlu0 %2140 }
 0x3f4   : > { %2482 = vst.msk [vmem:[%s4946_s15 + $0x58] sm:$0xff] %vm1034_vm3, %v2451_v50  ;;  %v2421_v47 = vadd.f32 %v2317_v5, %v2235_v56  ;;  %v2237_v62 = vmul.f32 %v2141_v63, %v5215_v57  ;;  %v5224_v50 = vld [vmem:[#allocation16_spill] sm:$0xff] }
 0x3f6   : > { %v2452_v52 = vmax.f32 %v2421_v47, 0.0 }
 0x3f7   : > { %v2322_v61 = vpop.permute.xlu0 %2321  ;;  %v2146_v30 = vpop.permute.xlu1 %2145 }
 0x3f8   : > { %2483 = vst.msk [vmem:[%s4946_s15 + $0x60] sm:$0xff] %vm1034_vm3, %v2452_v52  ;;  %v2422_v43 = vadd.f32 %v2322_v61, %v2236_v1  ;;  %v2238_v34 = vmul.f32 %v2146_v30, %v5216_v24  ;;  %v5225_v52 = vld [vmem:[#allocation17_spill] sm:$0xff] }
 0x3fa   : > { %v2453_v54 = vmax.f32 %v2422_v43, 0.0 }
 0x3fb   : > { %v2327_v2 = vpop.permute.xlu1 %2326  ;;  %v2151_v32 = vpop.permute.xlu0 %2150 }
 0x3fc   : > { %2484 = vst.msk [vmem:[%s4946_s15 + $0x68] sm:$0xff] %vm1034_vm3, %v2453_v54  ;;  %v2423_v39 = vadd.f32 %v2327_v2, %v2237_v62  ;;  %v2239_v16 = vmul.f32 %v2151_v32, %v5217_v17  ;;  %v5226_v54 = vld [vmem:[#allocation18_spill] sm:$0xff] }
 0x3fe   : > { %v2454_v18 = vmax.f32 %v2423_v39, 0.0 }
 0x3ff   : > { %v2332_v35 = vpop.permute.xlu0 %2331  ;;  %v2156_v7 = vpop.permute.xlu1 %2155 }
 0x400   : > { %2485 = vst.msk [vmem:[%s4946_s15 + $0x70] sm:$0xff] %vm1034_vm3, %v2454_v18  ;;  %v2424_v27 = vadd.f32 %v2332_v35, %v2238_v34  ;;  %v2240_v38 = vmul.f32 %v2156_v7, %v5218_v45  ;;  %v5227_v18 = vld [vmem:[#allocation19_spill] sm:$0xff] }
 0x402   : > { %v2455_v6 = vmax.f32 %v2424_v27, 0.0 }
 0x403   : > { %v2337_v40 = vpop.permute.xlu1 %2336  ;;  %v2161_v12 = vpop.permute.xlu0 %2160 }
 0x404   : > { %2486 = vst.msk [vmem:[%s4946_s15 + $0x78] sm:$0xff] %vm1034_vm3, %v2455_v6  ;;  %v2425_v36 = vadd.f32 %v2337_v40, %v2239_v16  ;;  %v2241_v4 = vmul.f32 %v2161_v12, %v5219_v0  ;;  %v5228_v6 = vld [vmem:[#allocation20_spill] sm:$0xff] }
 0x406   : > { %v2456_v55 = vmax.f32 %v2425_v36, 0.0 }
 0x407   : > { %v2342_v22 = vpop.permute.xlu0 %2341  ;;  %v2166_v31 = vpop.permute.xlu1 %2165 }
 0x408   : > { %2487 = vst.msk [vmem:[%s4946_s15 + $0x80] sm:$0xff] %vm1034_vm3, %v2456_v55  ;;  %v2426_v9 = vadd.f32 %v2342_v22, %v2240_v38  ;;  %v2242_v53 = vmul.f32 %v2166_v31, %v5220_v19  ;;  %v5229_v55 = vld [vmem:[#allocation21_spill] sm:$0xff] }
 0x40a   : > { %v2457_v15 = vmax.f32 %v2426_v9, 0.0 }
 0x40b   : > { %v2347_v14 = vpop.permute.xlu1 %2346  ;;  %v2171_v33 = vpop.permute.xlu0 %2170 }
 0x40c   : > { %2488 = vst.msk [vmem:[%s4946_s15 + $0x88] sm:$0xff] %vm1034_vm3, %v2457_v15  ;;  %v2427_v29 = vadd.f32 %v2347_v14, %v2241_v4  ;;  %v2243_v11 = vmul.f32 %v2171_v33, %v5221_v26  ;;  %v5230_v15 = vld [vmem:[#allocation22_spill] sm:$0xff] }
 0x40e   : > { %v2458_v21 = vmax.f32 %v2427_v29, 0.0  ;;  %v5231_v29 = vld [vmem:[#allocation23_spill] sm:$0xff] }
 0x40f   : > { %v2352_v59 = vpop.permute.xlu0 %2351  ;;  %v2176_v42 = vpop.permute.xlu1 %2175 }
 0x410   : > { %2489 = vst.msk [vmem:[%s4946_s15 + $0x90] sm:$0xff] %vm1034_vm3, %v2458_v21  ;;  %v2428_v8 = vadd.f32 %v2352_v59, %v2242_v53  ;;  %v2244_v13 = vmul.f32 %v2176_v42, %v5222_v60 }
 0x412   : > { %v2459_v49 = vmax.f32 %v2428_v8, 0.0 }
 0x413   : > { %v2357_v44 = vpop.permute.xlu1 %2356  ;;  %v2181_v23 = vpop.permute.xlu0 %2180 }
 0x414   : > { %2490 = vst.msk [vmem:[%s4946_s15 + $0x98] sm:$0xff] %vm1034_vm3, %v2459_v49  ;;  %v2429_v3 = vadd.f32 %v2357_v44, %v2243_v11  ;;  %v2245_v48 = vmul.f32 %v2181_v23, %v5223_v28 }
 0x416   : > { %v2460_v46 = vmax.f32 %v2429_v3, 0.0 }
 0x417   : > { %v2362_v58 = vpop.permute.xlu0 %2361  ;;  %v2186_v51 = vpop.permute.xlu1 %2185 }
 0x418   : > { %2491 = vst.msk [vmem:[%s4946_s15 + $0xa0] sm:$0xff] %vm1034_vm3, %v2460_v46  ;;  %v2430_v37 = vadd.f32 %v2362_v58, %v2244_v13  ;;  %v2246_v5 = vmul.f32 %v2186_v51, %v5224_v50 }
 0x41a   : > { %v2461_v10 = vmax.f32 %v2430_v37, 0.0 }
 0x41b   : > { %v2367_v20 = vpop.permute.xlu1 %2366  ;;  %v2191_v41 = vpop.permute.xlu0 %2190 }
 0x41c   : > { %2492 = vst.msk [vmem:[%s4946_s15 + $0xa8] sm:$0xff] %vm1034_vm3, %v2461_v10  ;;  %v2431_v56 = vadd.f32 %v2367_v20, %v2245_v48  ;;  %v2247_v61 = vmul.f32 %v2191_v41, %v5225_v52 }
 0x41e   : > { %v2462_v63 = vmax.f32 %v2431_v56, 0.0 }
 0x41f   : > { %v2372_v47 = vpop.permute.xlu0 %2371  ;;  %v2196_v25 = vpop.permute.xlu1 %2195 }
 0x420   : > { %2493 = vst.msk [vmem:[%s4946_s15 + $0xb0] sm:$0xff] %vm1034_vm3, %v2462_v63  ;;  %v2432_v1 = vadd.f32 %v2372_v47, %v2246_v5  ;;  %v2248_v2 = vmul.f32 %v2196_v25, %v5226_v54 }
 0x422   : > { %v2463_v30 = vmax.f32 %v2432_v1, 0.0 }
 0x423   : > { %v2377_v43 = vpop.permute.xlu1 %2376  ;;  %v2201_v57 = vpop.permute.xlu0 %2200 }
 0x424   : > { %2494 = vst.msk [vmem:[%s4946_s15 + $0xb8] sm:$0xff] %vm1034_vm3, %v2463_v30  ;;  %v2433_v62 = vadd.f32 %v2377_v43, %v2247_v61  ;;  %v2249_v35 = vmul.f32 %v2201_v57, %v5227_v18 }
 0x426   : > { %v2464_v32 = vmax.f32 %v2433_v62, 0.0 }
 0x427   : > { %v2382_v39 = vpop.permute.xlu0 %2381  ;;  %v2206_v24 = vpop.permute.xlu1 %2205 }
 0x428   : > { %2495 = vst.msk [vmem:[%s4946_s15 + $0xc0] sm:$0xff] %vm1034_vm3, %v2464_v32  ;;  %v2434_v34 = vadd.f32 %v2382_v39, %v2248_v2  ;;  %v2250_v40 = vmul.f32 %v2206_v24, %v5228_v6 }
 0x42a   : > { %v2465_v7 = vmax.f32 %v2434_v34, 0.0 }
 0x42b   : > { %v2387_v27 = vpop.permute.xlu1 %2386  ;;  %v2211_v17 = vpop.permute.xlu0 %2210 }
 0x42c   : > { %2496 = vst.msk [vmem:[%s4946_s15 + $0xc8] sm:$0xff] %vm1034_vm3, %v2465_v7  ;;  %v2435_v16 = vadd.f32 %v2387_v27, %v2249_v35  ;;  %v2251_v22 = vmul.f32 %v2211_v17, %v5229_v55 }
 0x42e   : > { %v2466_v12 = vmax.f32 %v2435_v16, 0.0 }
 0x42f   : > { %v2392_v36 = vpop.permute.xlu0 %2391  ;;  %v2216_v45 = vpop.permute.xlu1 %2215 }
 0x430   : > { %2497 = vst.msk [vmem:[%s4946_s15 + $0xd0] sm:$0xff] %vm1034_vm3, %v2466_v12  ;;  %v2436_v38 = vadd.f32 %v2392_v36, %v2250_v40  ;;  %v2252_v14 = vmul.f32 %v2216_v45, %v5230_v15 }
 0x432   : > { %v2467_v31 = vmax.f32 %v2436_v38, 0.0 }
 0x433   : > { %v2397_v9 = vpop.permute.xlu1 %2396  ;;  %v2221_v0 = vpop.permute.xlu0 %2220 }
 0x434   : > { %2498 = vst.msk [vmem:[%s4946_s15 + $0xd8] sm:$0xff] %vm1034_vm3, %v2467_v31  ;;  %v2437_v4 = vadd.f32 %v2397_v9, %v2251_v22  ;;  %v2253_v19 = vmul.f32 %v2221_v0, %v5231_v29 }
 0x436   : > { %v2468_v33 = vmax.f32 %v2437_v4, 0.0  ;;  %2508 = sbr.rel (!%p3832_p8) target bundleno = 1153 (0x481), region = 44 }
 0x437   : > { %v2402_v53 = vpop.permute.xlu0 %2401  ;;  %v2407_v21 = vpop.permute.xlu1 %2406 }
 0x438   : > { %2499 = vst.msk [vmem:[%s4946_s15 + $0xe0] sm:$0xff] %vm1034_vm3, %v2468_v33  ;;  %v2438_v59 = vadd.f32 %v2402_v53, %v2252_v14  ;;  %v2439_v42 = vadd.f32 %v2407_v21, %v2253_v19 }
 0x43a   : > { %v2469_v8 = vmax.f32 %v2438_v59, 0.0  ;;  %v2470_v26 = vmax.f32 %v2439_v42, 0.0 }
 0x43c   : > { %2500 = vst.msk [vmem:[%s4946_s15 + $0xe8] sm:$0xff] %vm1034_vm3, %v2469_v8  ;;  %2501 = vst.msk [vmem:[%s4946_s15 + $0xf0] sm:$0xff] %vm1034_vm3, %v2470_v26 }
 0x43d   : > { %s5244_s10 = smov (!%p2511_p11, %s2510_s10), 31 }
 0x43e   : > { %s2982_s27 = sshll.u32 %s5244_s10, 7 }
 0x43f   : > { %p2985_p6 = scmp.eq.s32.totalorder %s2982_s27, 0 }
 0x440   : > { %3626 = sdivrem.u32 (!%p2985_p6), %s5244_s10, 31 }
 0x441   : > { %2519 = sbr.rel (%p2985_p6) target bundleno = 1153 (0x481), region = 48 }
 0x449   : > { %s5052_s25 = spop.drf %3626 }
 0x44a   : > { %p2986_p8 = scmp.le.s32.totalorder %s5052_s25, 0 }
 0x44b   : > { %s5232_s19 = smov (!%p2986_p8), %s5046_s26  ;;  %s5233_s28 = smov (!%p2986_p8), %s4946_s15 }
 0x44c   : > { %2815 = sbr.rel (%p2986_p8) target bundleno = 1124 (0x464), region = 136  ;;  %s5061_s29 = smov (!%p2986_p8), 0  }
 0x44d   : > { %s5063_s5 = smov (!%p2986_p8), 0  }
 0x453 LB: >> { %v2643_v11 = vld [vmem:[%s3732_s28] sm:$0xff]  ;;  %v2645_v49 = vld [vmem:[%s3732_s28 + $0x8] sm:$0xff]  ;;  %v2647_v44 = vld [vmem:[%s3732_s28 + $0x10] sm:$0xff]  ;;  %s2705_s14 = sadd.s32 1, %s3736_s29  ;;  %s2637_s5 = sadd.s32 1, %s3740_s5   ;;  %s3740_s5 = sphi %s5063_s5, %s2637_s5   ;;  %s3736_s29 = sphi %s5061_s29, %s5236_s29   ;;  %s3732_s28 = sphi %s5233_s28, %s5235_s28   ;;  %s3728_s19 = sphi %s5232_s19, %s5234_s19  }
 0x454   : >> { %2644 = vst [vmem:[%s3728_s19] sm:$0xff] %v2643_v11  ;;  %2646 = vst [vmem:[%s3728_s19 + $0x8] sm:$0xff] %v2645_v49  ;;  %v2649_v23 = vld [vmem:[%s3732_s28 + $0x18] sm:$0xff]  ;;  %v2651_v3 = vld [vmem:[%s3732_s28 + $0x20] sm:$0xff]  ;;  %p2706_p9 = scmp.ge.s32.totalorder %s2705_s14, %s5052_s25  ;;  %p2636_p10 = scmp.ge.s32.totalorder %s2637_s5, %s5052_s25 }
 0x455   : >> { %2648 = vst [vmem:[%s3728_s19 + $0x10] sm:$0xff] %v2647_v44  ;;  %v2653_v60 = vld [vmem:[%s3732_s28 + $0x28] sm:$0xff]  ;;  %2650 = vst [vmem:[%s3728_s19 + $0x18] sm:$0xff] %v2649_v23  ;;  %v2655_v13 = vld [vmem:[%s3732_s28 + $0x30] sm:$0xff] }
 0x456   : >> { %2652 = vst [vmem:[%s3728_s19 + $0x20] sm:$0xff] %v2651_v3  ;;  %2654 = vst [vmem:[%s3728_s19 + $0x28] sm:$0xff] %v2653_v60  ;;  %v2657_v46 = vld [vmem:[%s3732_s28 + $0x38] sm:$0xff]  ;;  %v2659_v58 = vld [vmem:[%s3732_s28 + $0x40] sm:$0xff]  ;;  %s5246_s14 = smov (%p2706_p9, %s2705_s14), 0 }
 0x457   : >> { %2656 = vst [vmem:[%s3728_s19 + $0x30] sm:$0xff] %v2655_v13  ;;  %2658 = vst [vmem:[%s3728_s19 + $0x38] sm:$0xff] %v2657_v46  ;;  %v2661_v51 = vld [vmem:[%s3732_s28 + $0x48] sm:$0xff]  ;;  %v2663_v37 = vld [vmem:[%s3732_s28 + $0x50] sm:$0xff]  ;;  %s2708_s7 = smul.u32 248, %s5246_s14  ;;  %s5236_s29 = smov %s5246_s14 }
 0x458   : >> { %2660 = vst [vmem:[%s3728_s19 + $0x40] sm:$0xff] %v2659_v58  ;;  %v2665_v28 = vld [vmem:[%s3732_s28 + $0x58] sm:$0xff]  ;;  %2662 = vst [vmem:[%s3728_s19 + $0x48] sm:$0xff] %v2661_v51  ;;  %v2667_v48 = vld [vmem:[%s3732_s28 + $0x60] sm:$0xff] }
 0x459   : >> { %2664 = vst [vmem:[%s3728_s19 + $0x50] sm:$0xff] %v2663_v37  ;;  %2666 = vst [vmem:[%s3728_s19 + $0x58] sm:$0xff] %v2665_v28  ;;  %v2669_v10 = vld [vmem:[%s3732_s28 + $0x68] sm:$0xff]  ;;  %v2671_v20 = vld [vmem:[%s3732_s28 + $0x70] sm:$0xff]  ;;  %s2710_s8 = scalar_lea.vmem %s4946_s15, %s2708_s7 [#allocation4]   ;;  %s2711_s11 = scalar_lea.vmem %s5046_s26, %s2708_s7  }
 0x45a   : >> { %2668 = vst [vmem:[%s3728_s19 + $0x60] sm:$0xff] %v2667_v48  ;;  %2670 = vst [vmem:[%s3728_s19 + $0x68] sm:$0xff] %v2669_v10  ;;  %v2673_v41 = vld [vmem:[%s3732_s28 + $0x78] sm:$0xff]  ;;  %v2675_v56 = vld [vmem:[%s3732_s28 + $0x80] sm:$0xff] }
 0x45b   : >> { %2672 = vst [vmem:[%s3728_s19 + $0x70] sm:$0xff] %v2671_v20  ;;  %v2677_v50 = vld [vmem:[%s3732_s28 + $0x88] sm:$0xff]  ;;  %2674 = vst [vmem:[%s3728_s19 + $0x78] sm:$0xff] %v2673_v41  ;;  %v2679_v5 = vld [vmem:[%s3732_s28 + $0x90] sm:$0xff] }
 0x45c   : >> { %2676 = vst [vmem:[%s3728_s19 + $0x80] sm:$0xff] %v2675_v56  ;;  %2678 = vst [vmem:[%s3728_s19 + $0x88] sm:$0xff] %v2677_v50  ;;  %v2681_v63 = vld [vmem:[%s3732_s28 + $0x98] sm:$0xff]  ;;  %v2683_v47 = vld [vmem:[%s3732_s28 + $0xa0] sm:$0xff] }
 0x45d   : >> { %2680 = vst [vmem:[%s3728_s19 + $0x90] sm:$0xff] %v2679_v5  ;;  %2682 = vst [vmem:[%s3728_s19 + $0x98] sm:$0xff] %v2681_v63  ;;  %v2685_v25 = vld [vmem:[%s3732_s28 + $0xa8] sm:$0xff]  ;;  %v2687_v1 = vld [vmem:[%s3732_s28 + $0xb0] sm:$0xff]  ;;  %2639 = sbr.rel (!%p2636_p10) target bundleno = 1107 (0x453), region = 142 }
 0x45e   : >> { %2684 = vst [vmem:[%s3728_s19 + $0xa0] sm:$0xff] %v2683_v47  ;;  %v2689_v52 = vld [vmem:[%s3732_s28 + $0xb8] sm:$0xff]  ;;  %2686 = vst [vmem:[%s3728_s19 + $0xa8] sm:$0xff] %v2685_v25  ;;  %v2691_v61 = vld [vmem:[%s3732_s28 + $0xc0] sm:$0xff] }
 0x45f   : >> { %2688 = vst [vmem:[%s3728_s19 + $0xb0] sm:$0xff] %v2687_v1  ;;  %2690 = vst [vmem:[%s3728_s19 + $0xb8] sm:$0xff] %v2689_v52  ;;  %v2693_v30 = vld [vmem:[%s3732_s28 + $0xc8] sm:$0xff]  ;;  %v2695_v43 = vld [vmem:[%s3732_s28 + $0xd0] sm:$0xff] }
 0x460   : >> { %2692 = vst [vmem:[%s3728_s19 + $0xc0] sm:$0xff] %v2691_v61  ;;  %2694 = vst [vmem:[%s3728_s19 + $0xc8] sm:$0xff] %v2693_v30  ;;  %v2697_v57 = vld [vmem:[%s3732_s28 + $0xd8] sm:$0xff]  ;;  %v2699_v62 = vld [vmem:[%s3732_s28 + $0xe0] sm:$0xff] }
 0x461   : >> { %2696 = vst [vmem:[%s3728_s19 + $0xd0] sm:$0xff] %v2695_v43  ;;  %v2701_v54 = vld [vmem:[%s3732_s28 + $0xe8] sm:$0xff]  ;;  %2698 = vst [vmem:[%s3728_s19 + $0xd8] sm:$0xff] %v2697_v57  ;;  %v2703_v2 = vld [vmem:[%s3732_s28 + $0xf0] sm:$0xff]  ;;  %s5235_s28 = smov %s2710_s8 }
 0x462   : >> { %2700 = vst [vmem:[%s3728_s19 + $0xe0] sm:$0xff] %v2699_v62  ;;  %2702 = vst [vmem:[%s3728_s19 + $0xe8] sm:$0xff] %v2701_v54 }
 0x463   : >> { %2704 = vst [vmem:[%s3728_s19 + $0xf0] sm:$0xff] %v2703_v2  ;;  %s5234_s19 = smov %s2711_s11 }
 0x464 PF: > { %3628 = sdivrem.u32 %s5244_s10, 31 }
 0x465   : > { %s2987_s13 = smul.u32 248, %s5052_s25 }
 0x467   : > { %s2716_s18 = scalar_lea.vmem %s4946_s15, %s2987_s13 [#allocation4]   ;;  %s2718_s30 = scalar_lea.vmem %s5046_s26, %s2987_s13  }
 0x46d   : > { %s3629_s6 = spop.drf %3628 }
 0x46e   : > { %p2989_p12 = scmp.le.s32.totalorder %s3629_s6, 0 }
 0x46f   : > { %s3742_s9 = smov (!%p2989_p12), %s2718_s30   ;;  %s3746_s12 = smov (!%p2989_p12), %s2716_s18  }
 0x470   : > { %2829 = sbr.rel (%p2989_p12) target bundleno = 1153 (0x481), region = 147  ;;  %s3750_s24 = smov (!%p2989_p12), 0  }
 0x471   : > { %s3754_s21 = smov (!%p2989_p12), 0  }
 0x477 LB: >> { %v2728_v32 = vld [vmem:[%s3748_s12] sm:$0xff]  ;;  %s2730_s22 = sadd.s32 1, %s3752_s24  ;;  %s2722_s21 = sadd.s32 1, %s3756_s21   ;;  %s3756_s21 = sphi %s3754_s21, %s2722_s21   ;;  %s3752_s24 = sphi %s3750_s24, %s3751_s24   ;;  %s3748_s12 = sphi %s3746_s12, %s2735_s12   ;;  %s3744_s9 = sphi %s3742_s9, %s2736_s9  }
 0x478   : >> { %2729 = vst [vmem:[%s3744_s9] sm:$0xff] %v2728_v32  ;;  %p2731_p13 = scmp.ge.s32.totalorder %s2730_s22, %s3629_s6  ;;  %p2721_p1 = scmp.ge.s32.totalorder %s2722_s21, %s3629_s6 }
 0x47a   : >> { %s5248_s22 = smov (%p2731_p13, %s2730_s22), 0  ;;  %2724 = sbr.rel (!%p2721_p1) target bundleno = 1143 (0x477), region = 153 }
 0x47b   : >> { %s2990_s15 = sshll.u32 %s5248_s22, 3  ;;  %s3751_s24 = smov %s5248_s22  }
 0x47c   : >> { %s2735_s12 = scalar_lea.vmem %s2716_s18, %s2990_s15 [#allocation4]   ;;  %s2736_s9 = scalar_lea.vmem %s2718_s30, %s2990_s15  }
 0x481 PF: > { %p14_p2 = scmp.ge.s32.totalorder %s3814_s20, 4   ;;  %s5237_s15 = smov %s3716_s16 }
 0x482   : > { %s5238_s16 = smov %s3720_s17  ;;  %s5239_s17 = smov %s3824_s23 }
 0x483   : > { %s5240_s18 = smov %s3814_s20  ;;  %16 = sbr.rel (!%p14_p2) target bundleno = 3 (0x3), region = 164 }
 0x48a   :  { %2752 = vsyncpa [#allocation3], 1 }
 0x48b   :  { %2754 = vsyncpa [#allocation3 + $0x1], 1 }

</bundles_post_ra>
